<compile_context>
chip_gen: v6e
topology: v6e:2x2x1
jax: 0.10.0
libtpu: 0.0.40
codegen_flags: <defaults>
</compile_context>

<pallas_src>
import functools

import jax
import jax.numpy as jnp
from jax.experimental import pallas as pl
from jax.experimental.pallas import tpu as pltpu

_LANE = 128
_SUBLANE = 8


def _round_up(x, m):
    return (x + m - 1) // m * m


def _cdiv(a, b):
    return -(-a // b)


def _mlp_kernel(x_ref, *refs, depth: int):
    """Fused MLP tile: depth hidden (Linear+ReLU) layers + final Linear.

    x_ref                 : (TM, Kpad)    bf16 activation tile (lane-padded 784->896)
    refs[0..depth]        : (K_l, N_l)    bf16 transposed weights (resident, single-buffered)
    refs[depth+1]         : (depth, 512)  f32 packed hidden biases
    refs[depth+2]         : (1, Npad)     f32 final bias (lane-padded 10->128)
    refs[depth+3]         : (TM, Npad)    f32 output tile
    refs[depth+4]         : (TM, 512)     bf16 VMEM scratch (hidden activation)
    """
    num_layers = depth + 1
    w_refs = refs[:num_layers]
    b_hid_ref = refs[num_layers]
    b_last_ref = refs[num_layers + 1]
    o_ref = refs[num_layers + 2]
    h_ref = refs[num_layers + 3]

    # layer 0: 896 -> 512, ReLU   (bf16 MXU matmul, f32 accumulate + f32 epilogue)
    y = jnp.dot(x_ref[...], w_refs[0][...], preferred_element_type=jnp.float32)
    h_ref[...] = jnp.maximum(y + b_hid_ref[0:1, :], 0.0).astype(jnp.bfloat16)

    # hidden layers 1..depth-1: 512 -> 512, ReLU (activation stays resident as bf16)
    for l in range(1, depth):
        y = jnp.dot(h_ref[...], w_refs[l][...], preferred_element_type=jnp.float32)
        h_ref[...] = jnp.maximum(y + b_hid_ref[l:l + 1, :], 0.0).astype(jnp.bfloat16)

    # final layer: 512 -> 10 (lane-padded to 128), no ReLU
    y = jnp.dot(h_ref[...], w_refs[depth][...], preferred_element_type=jnp.float32)
    o_ref[...] = (y + b_last_ref[...]).astype(o_ref.dtype)


def init_params(depth: int, key):
    """Deterministic init mirroring nn.Linear default (uniform +/- 1/sqrt(fan_in)).

    Returns PyTorch-layout params: list of (weight (out, in) f32, bias (out,) f32).
    """
    dims = [28 * 28] + [512 for _ in range(depth)] + [10]
    params = []
    for i in range(1, len(dims)):
        fan_in, fan_out = dims[i - 1], dims[i]
        key, kw, kb = jax.random.split(key, 3)
        bound = 1.0 / jnp.sqrt(jnp.float32(fan_in))
        w = jax.random.uniform(kw, (fan_out, fan_in), jnp.float32, -bound, bound)
        b = jax.random.uniform(kb, (fan_out,), jnp.float32, -bound, bound)
        params.append((w, b))
    return params


def prepare_params(params):
    """One-time conversion: torch (out,in) f32 -> kernel layout.

    * weights transposed to (in, out), zero-padded (layer 0 rows 784->896,
      last layer cols 10->128) and cast to bf16 (half the HBM weight bytes,
      native MXU path)
    * hidden biases packed into one (depth, 512) f32 array
    * final bias kept f32, lane-padded to (1, 128)
    """
    n = len(params)
    depth = n - 1
    w_list, b_hid_rows = [], []
    b_last = None
    for i, (w, b) in enumerate(params):
        w_t = jnp.asarray(w, jnp.float32).T          # (in, out)
        b = jnp.asarray(b, jnp.float32)
        if i == 0:
            k = w_t.shape[0]
            k_pad = _round_up(k, _LANE)              # 784 -> 896
            if k_pad != k:
                w_t = jnp.pad(w_t, ((0, k_pad - k), (0, 0)))
        if i == depth:
            out = w_t.shape[1]
            out_pad = _round_up(out, _LANE)          # 10 -> 128
            if out_pad != out:
                w_t = jnp.pad(w_t, ((0, 0), (0, out_pad - out)))
                b = jnp.pad(b, (0, out_pad - out))
            b_last = b.reshape(1, -1)
        else:
            b_hid_rows.append(b)
        w_list.append(w_t.astype(jnp.bfloat16))
    b_hidden = jnp.stack(b_hid_rows, axis=0)         # (depth, 512) f32
    return tuple(w_list), b_hidden, b_last


def _vmem_cap_bytes():
    try:
        return int(pltpu.get_tpu_info().vmem_capacity_bytes)
    except Exception:
        return 128 * 1024 * 1024   # v5e/v6e default; v7x reports 64 MiB


def _resident_spec(shape):
    # Constant-index (weight/bias) inputs are fetched once; single-buffer them
    # so they don't cost 2x VMEM (critical on v7x's 64 MiB per-TC VMEM).
    idx_map = lambda i: (0,) * len(shape)
    try:
        return pl.BlockSpec(shape, idx_map, pipeline_mode=pl.Buffered(1))
    except TypeError:
        return pl.BlockSpec(shape, idx_map)


def neural_network_forward(x_nchw, prepped):
    """Forward pass equivalent to NeuralNetwork.forward (single fused kernel).

    x_nchw:  (B, 1, 28, 28) float32
    prepped: output of prepare_params()
    returns: (B, 10) float32 logits
    """
    w_list, b_hidden, b_last = prepped
    depth = len(w_list) - 1
    assert depth >= 1, "kernel assumes at least one 512-wide hidden layer"

    B = x_nchw.shape[0]
    x = x_nchw.reshape(B, -1)                      # nn.Flatten(): (B, 784)
    K = x.shape[1]
    Kpad = w_list[0].shape[0]                      # 896 (lane-padded)
    hidden = w_list[0].shape[1]                    # 512
    n_out_pad = w_list[-1].shape[1]                # 128
    n_out = 10                                     # true logit count (module spec)

    # batch tiling: TM rows per grid step; guarantee >= 2 steps for B >= 16 so
    # the "parallel" batch axis shards across v7x's two TensorCores.
    _TM_CAP = 256   # TODO(synk): sweep TM up to 512 on v5e/v6e (128 MiB VMEM)
    B8 = _round_up(B, _SUBLANE)
    n_tiles = _cdiv(B8, _TM_CAP)
    if B >= 16:
        n_tiles = max(n_tiles, 2)
    TM = _round_up(_cdiv(B8, n_tiles), _SUBLANE)
    Bp = _round_up(B, TM)

    # pad lanes (784 -> 896, zeros) and batch rows, then cast once to bf16
    if Kpad != K:
        x = jnp.pad(x, ((0, 0), (0, Kpad - K)))
    if Bp != B:
        x = jnp.pad(x, ((0, Bp - B), (0, 0)))
    x = x.astype(jnp.bfloat16)

    # VMEM budget: resident weights/biases (single-buffered) + pipelined x/out
    # tiles (double-buffered) + bf16 hidden scratch + compiler headroom,
    # capped at ~3/4 of physical VMEM (v7x: ~48 MiB, v5e/v6e: ~96 MiB).
    resident_bytes = sum(int(w.size) * w.dtype.itemsize for w in w_list)
    resident_bytes += int(b_hidden.size) * 4 + int(b_last.size) * 4
    tile_bytes = (2 * TM * Kpad * 2          # x tile, bf16, double-buffered
                  + 2 * TM * n_out_pad * 4   # out tile, f32, double-buffered
                  + TM * hidden * 2)         # bf16 hidden scratch
    vmem_limit = resident_bytes + tile_bytes + 16 * 1024 * 1024
    vmem_limit = max(vmem_limit, 32 * 1024 * 1024)
    vmem_limit = min(vmem_limit, (_vmem_cap_bytes() * 3) // 4, 100 * 1024 * 1024)

    in_specs = [pl.BlockSpec((TM, Kpad), lambda i: (i, 0))]
    for w in w_list:
        in_specs.append(_resident_spec(w.shape))
    in_specs.append(_resident_spec(b_hidden.shape))
    in_specs.append(_resident_spec(b_last.shape))

    kernel = functools.partial(_mlp_kernel, depth=depth)
    out = pl.pallas_call(
        kernel,
        out_shape=jax.ShapeDtypeStruct((Bp, n_out_pad), jnp.float32),
        grid=(Bp // TM,),
        in_specs=in_specs,
        out_specs=pl.BlockSpec((TM, n_out_pad), lambda i: (i, 0)),
        scratch_shapes=[pltpu.VMEM((TM, hidden), jnp.bfloat16)],
        compiler_params=pltpu.CompilerParams(
            dimension_semantics=("parallel",),
            vmem_limit_bytes=int(vmem_limit),
        ),
    )(x, *w_list, b_hidden, b_last)

    return out[:B, :n_out]


if __name__ == "__main__":
    depth = 2          # number of 512-wide hidden layers
    batch = 8          # small batch, multiple of 8 (sublane-friendly)

    key = jax.random.PRNGKey(0)
    key, kx = jax.random.split(key)
    x = jax.random.normal(kx, (batch, 1, 28, 28), jnp.float32)

    params = init_params(depth, key)          # PyTorch-layout f32 params
    prepped = prepare_params(params)          # pre-transposed / padded bf16 kernel params

    fwd = jax.jit(neural_network_forward)
    out = jax.block_until_ready(fwd(x, prepped))

    # sanity check against a plain-JAX reference with the same bf16-operand /
    # f32-accumulate numerics as the kernel
    ref = x.reshape(batch, -1)
    for (w, b) in params[:-1]:
        ref = jnp.maximum(
            jnp.dot(ref.astype(jnp.bfloat16), w.T.astype(jnp.bfloat16),
                    preferred_element_type=jnp.float32) + b, 0.0)
    w, b = params[-1]
    ref = jnp.dot(ref.astype(jnp.bfloat16), w.T.astype(jnp.bfloat16),
                  preferred_element_type=jnp.float32) + b

    assert out.shape == (batch, 10)
    assert jnp.allclose(out, ref, atol=5e-2, rtol=5e-2), float(
        jnp.max(jnp.abs(out - ref)))

    print("KERNEL_OK")
</pallas_src>

<mosaic_0001>
module attributes {stable_mosaic.version = 11 : i64} {
  func.func @_mlp_kernel(%arg0: i32, %arg1: memref<8x896xbf16, #tpu.memory_space<vmem>>, %arg2: memref<896x512xbf16, #tpu.memory_space<vmem>>, %arg3: memref<512x512xbf16, #tpu.memory_space<vmem>>, %arg4: memref<512x128xbf16, #tpu.memory_space<vmem>>, %arg5: memref<2x512xf32, #tpu.memory_space<vmem>>, %arg6: memref<1x128xf32, #tpu.memory_space<vmem>>, %arg7: memref<8x128xf32, #tpu.memory_space<vmem>>, %arg8: memref<8x512xbf16, #tpu.memory_space<vmem>>) attributes {dimension_semantics = [#tpu.dimension_semantics<parallel>], iteration_bounds = array<i64: 1>, scalar_prefetch = 0 : i64, scratch_operands = 1 : i64, tpu.core_type = #tpu.core_type<tc>, window_params = [{transform_indices = @transform_0, window_bounds = array<i64: 8, 896>}, {pipeline_mode = #tpu.pipeline_mode<synchronous>, transform_indices = @transform_1, window_bounds = array<i64: 896, 512>}, {pipeline_mode = #tpu.pipeline_mode<synchronous>, transform_indices = @transform_2, window_bounds = array<i64: 512, 512>}, {pipeline_mode = #tpu.pipeline_mode<synchronous>, transform_indices = @transform_3, window_bounds = array<i64: 512, 128>}, {pipeline_mode = #tpu.pipeline_mode<synchronous>, transform_indices = @transform_4, window_bounds = array<i64: 2, 512>}, {pipeline_mode = #tpu.pipeline_mode<synchronous>, transform_indices = @transform_5, window_bounds = array<i64: 1, 128>}, {transform_indices = @transform_6, window_bounds = array<i64: 8, 128>}]} {
    %c0 = arith.constant 0 : index
    %c0_0 = arith.constant 0 : index
    %0 = vector.load %arg1[%c0, %c0_0] : memref<8x896xbf16, #tpu.memory_space<vmem>>, vector<8x896xbf16>
    %c0_1 = arith.constant 0 : index
    %c0_2 = arith.constant 0 : index
    %1 = vector.load %arg2[%c0_1, %c0_2] : memref<896x512xbf16, #tpu.memory_space<vmem>>, vector<896x512xbf16>
    %cst = arith.constant dense<0.000000e+00> : vector<8x512xf32>
    %2 = tpu.matmul %0, %1, %cst {dimension_numbers = #tpu.dot_dimension_numbers<[1], [0], [0], [1], [0, 0, 1, 1], [], []>} : vector<8x896xbf16>, vector<896x512xbf16>, vector<8x512xf32> -> vector<8x512xf32>
    %c0_3 = arith.constant 0 : index
    %c0_4 = arith.constant 0 : index
    %3 = vector.load %arg5[%c0_3, %c0_4] : memref<2x512xf32, #tpu.memory_space<vmem>>, vector<1x512xf32>
    %4 = vector.broadcast %3 : vector<1x512xf32> to vector<8x512xf32>
    %5 = arith.addf %2, %4 : vector<8x512xf32>
    %cst_5 = arith.constant 0.000000e+00 : f32
    %6 = vector.broadcast %cst_5 : f32 to vector<8x512xf32>
    %7 = arith.maximumf %5, %6 : vector<8x512xf32>
    %8 = arith.truncf %7 : vector<8x512xf32> to vector<8x512xbf16>
    %c0_6 = arith.constant 0 : index
    %c0_7 = arith.constant 0 : index
    %9 = vector.load %arg8[%c0_6, %c0_7] : memref<8x512xbf16, #tpu.memory_space<vmem>>, vector<8x512xbf16>
    tpu.vector_store %arg8[%c0_6, %c0_7], %8 {strides = array<i32>} : memref<8x512xbf16, #tpu.memory_space<vmem>>, vector<8x512xbf16>,
    %c0_8 = arith.constant 0 : index
    %c0_9 = arith.constant 0 : index
    %10 = vector.load %arg8[%c0_8, %c0_9] : memref<8x512xbf16, #tpu.memory_space<vmem>>, vector<8x512xbf16>
    %c0_10 = arith.constant 0 : index
    %c0_11 = arith.constant 0 : index
    %11 = vector.load %arg3[%c0_10, %c0_11] : memref<512x512xbf16, #tpu.memory_space<vmem>>, vector<512x512xbf16>
    %cst_12 = arith.constant dense<0.000000e+00> : vector<8x512xf32>
    %12 = tpu.matmul %10, %11, %cst_12 {dimension_numbers = #tpu.dot_dimension_numbers<[1], [0], [0], [1], [0, 0, 1, 1], [], []>} : vector<8x512xbf16>, vector<512x512xbf16>, vector<8x512xf32> -> vector<8x512xf32>
    %c1 = arith.constant 1 : index
    %c0_13 = arith.constant 0 : index
    %13 = vector.load %arg5[%c1, %c0_13] : memref<2x512xf32, #tpu.memory_space<vmem>>, vector<1x512xf32>
    %14 = vector.broadcast %13 : vector<1x512xf32> to vector<8x512xf32>
    %15 = arith.addf %12, %14 : vector<8x512xf32>
    %cst_14 = arith.constant 0.000000e+00 : f32
    %16 = vector.broadcast %cst_14 : f32 to vector<8x512xf32>
    %17 = arith.maximumf %15, %16 : vector<8x512xf32>
    %18 = arith.truncf %17 : vector<8x512xf32> to vector<8x512xbf16>
    %c0_15 = arith.constant 0 : index
    %c0_16 = arith.constant 0 : index
    %19 = vector.load %arg8[%c0_15, %c0_16] : memref<8x512xbf16, #tpu.memory_space<vmem>>, vector<8x512xbf16>
    tpu.vector_store %arg8[%c0_15, %c0_16], %18 {strides = array<i32>} : memref<8x512xbf16, #tpu.memory_space<vmem>>, vector<8x512xbf16>,
    %c0_17 = arith.constant 0 : index
    %c0_18 = arith.constant 0 : index
    %20 = vector.load %arg8[%c0_17, %c0_18] : memref<8x512xbf16, #tpu.memory_space<vmem>>, vector<8x512xbf16>
    %c0_19 = arith.constant 0 : index
    %c0_20 = arith.constant 0 : index
    %21 = vector.load %arg4[%c0_19, %c0_20] : memref<512x128xbf16, #tpu.memory_space<vmem>>, vector<512x128xbf16>
    %cst_21 = arith.constant dense<0.000000e+00> : vector<8x128xf32>
    %22 = tpu.matmul %20, %21, %cst_21 {dimension_numbers = #tpu.dot_dimension_numbers<[1], [0], [0], [1], [0, 0, 1, 1], [], []>} : vector<8x512xbf16>, vector<512x128xbf16>, vector<8x128xf32> -> vector<8x128xf32>
    %c0_22 = arith.constant 0 : index
    %c0_23 = arith.constant 0 : index
    %23 = vector.load %arg6[%c0_22, %c0_23] : memref<1x128xf32, #tpu.memory_space<vmem>>, vector<1x128xf32>
    %24 = vector.broadcast %23 : vector<1x128xf32> to vector<8x128xf32>
    %25 = arith.addf %22, %24 : vector<8x128xf32>
    %c0_24 = arith.constant 0 : index
    %c0_25 = arith.constant 0 : index
    %26 = vector.load %arg7[%c0_24, %c0_25] : memref<8x128xf32, #tpu.memory_space<vmem>>, vector<8x128xf32>
    tpu.vector_store %arg7[%c0_24, %c0_25], %25 {strides = array<i32>} : memref<8x128xf32, #tpu.memory_space<vmem>>, vector<8x128xf32>,
    return
  }
  func.func @transform_0(%arg0: i32) -> (i32, i32) {
    %c0_i32 = arith.constant 0 : i32
    %c0_i32_0 = arith.constant 0 : i32
    return %arg0, %c0_i32 : i32, i32
  }
  func.func @transform_1(%arg0: i32) -> (i32, i32) {
    %c0_i32 = arith.constant 0 : i32
    %c0_i32_0 = arith.constant 0 : i32
    %c0_i32_1 = arith.constant 0 : i32
    return %c0_i32, %c0_i32_0 : i32, i32
  }
  func.func @transform_2(%arg0: i32) -> (i32, i32) {
    %c0_i32 = arith.constant 0 : i32
    %c0_i32_0 = arith.constant 0 : i32
    %c0_i32_1 = arith.constant 0 : i32
    return %c0_i32, %c0_i32_0 : i32, i32
  }
  func.func @transform_3(%arg0: i32) -> (i32, i32) {
    %c0_i32 = arith.constant 0 : i32
    %c0_i32_0 = arith.constant 0 : i32
    %c0_i32_1 = arith.constant 0 : i32
    return %c0_i32, %c0_i32_0 : i32, i32
  }
  func.func @transform_4(%arg0: i32) -> (i32, i32) {
    %c0_i32 = arith.constant 0 : i32
    %c0_i32_0 = arith.constant 0 : i32
    %c0_i32_1 = arith.constant 0 : i32
    return %c0_i32, %c0_i32_0 : i32, i32
  }
  func.func @transform_5(%arg0: i32) -> (i32, i32) {
    %c0_i32 = arith.constant 0 : i32
    %c0_i32_0 = arith.constant 0 : i32
    %c0_i32_1 = arith.constant 0 : i32
    return %c0_i32, %c0_i32_0 : i32, i32
  }
  func.func @transform_6(%arg0: i32) -> (i32, i32) {
    %c0_i32 = arith.constant 0 : i32
    %c0_i32_0 = arith.constant 0 : i32
    return %arg0, %c0_i32 : i32, i32
  }
}

</mosaic_0001>

<bundles_post_ra>
// kernel: neural_network_forward.1
= control target key start
LH: loop header
LB: loop body
LE: loop exit
PB: predicated region body
PF: predicated region fallthrough
CT: control target
= control target key end

     0   :  { %11 = vsyncpa [#allocation4], 0  ;;  %s4518_s0 = inlined_call_operand.vmem [shape: bf16[8,896], index: 0, kind: input, shape index: {}]   ;;  %s4519_s1 = inlined_call_operand.hbm [shape: bf16[896,512], index: 1, kind: input, shape index: {}]   ;;  %s4520_s2 = inlined_call_operand.hbm [shape: bf16[512,512], index: 2, kind: input, shape index: {}]   ;;  %s4521_s3 = inlined_call_operand.vmem [shape: bf16[512,128], index: 3, kind: input, shape index: {}]   ;;  %s4522_s4 = inlined_call_operand.vmem [shape: f32[2,512], index: 4, kind: input, shape index: {}]   ;;  %s4523_s5 = inlined_call_operand.vmem [shape: f32[1,128], index: 5, kind: input, shape index: {}]   ;;  %s4524_s6 = inlined_call_operand.hbm [shape: f32[8,128], index: 6, kind: output, shape index: {}]  }
   0x1   :  { %12 = vsyncpa [#allocation7], 0 }
   0x2   :  { %13 = vsyncpa [#allocation5], 0  ;;  %s4268_s21 = smov [#allocation3]  }
   0x3   :  { %s21_s22 = sshll.u32 %s4268_s21, 4  ;;  %s22_s22 = int_to_ptr.vmem [resolvable:$true] %s21_s22 }
   0x4   :  { %s4210_s23 = scalar_lea.vmem %s22_s22, 28672  ;;  %p4215_p1 = scmp.lt.s32.totalorder %s22_s22, %s22_s22 }
   0x5   :  { %p4211_p0 = scmp.ne.s32.totalorder %s22_s22, %s4210_s23  ;;  %p4216_p2 = scmp.lt.s32.totalorder %s4210_s23, %s4210_s23 }
   0x7   :  { %p4217_p3 = por %p4216_p2, %p4215_p1 }
   0x9   :  { %p4218_p4 = pnand %p4217_p3, %p4211_p0 }
   0xb   :  { %4221 = shalt.err (!%p4218_p4)
}
   0xc   :  { %s4269_s24 = smov 256   ;;  %s4270_s25 = smov 16  }
   0xd   :  { %27 = dma.hbm_to_vmem [thread:$0]  %s4519_s1, 28672, %s22_s22, [#allocation4], %s4269_s24, %s4269_s24, %s4270_s25  }
   0xe   :  { %s4271_s28 = smov [#allocation6]  }
   0xf   :  { %s33_s29 = sshll.u32 %s4271_s28, 4  ;;  %s34_s29 = int_to_ptr.vmem [resolvable:$true] %s33_s29 }
  0x10   :  { %s4230_s30 = scalar_lea.vmem %s34_s29, 16384  ;;  %p4235_p6 = scmp.lt.s32.totalorder %s34_s29, %s34_s29 }
  0x11   :  { %p4231_p5 = scmp.ne.s32.totalorder %s34_s29, %s4230_s30  ;;  %p4236_p7 = scmp.lt.s32.totalorder %s4230_s30, %s4230_s30 }
  0x13   :  { %p4237_p8 = por %p4236_p7, %p4235_p6 }
  0x15   :  { %p4238_p9 = pnand %p4237_p8, %p4231_p5 }
  0x17   :  { %4241 = shalt.err (!%p4238_p9)
}
  0x18   :  { %39 = dma.hbm_to_vmem [thread:$0]  %s4520_s2, 16384, %s34_s29, [#allocation7], %s4269_s24, %s4269_s24, %s4270_s25  }
  0x19   :  { %4262 = dma.done.wait [#allocation4], 28672  }
  0x1a   :  { %4263 = vsyncadd [#allocation4], 4294938624 }
  0x1b   :  { %4264 = dma.done.wait [#allocation7], 16384  }
  0x1c   :  { %4265 = vsyncadd [#allocation7], 4294950912  ;;  %v3634_v0 = vld [vmem:[#allocation3 + $0xe4] ss:$16 sps:$4 sm:$0xff]   ;;  %v3638_v2 = vld [vmem:[#allocation3 + $0xe0] ss:$16 sps:$4 sm:$0xff]  }
  0x1d   :  { %v3636_v1 = vld [vmem:[#allocation3 + $0x2e4] ss:$16 sps:$4 sm:$0xff]   ;;  %1448 = vmatprep.subr.bf16.mxu0 %v3634_v0  ;;  %v3639_v3 = vld [vmem:[#allocation3 + $0x2e0] ss:$16 sps:$4 sm:$0xff]   ;;  %v54_v48 = vld [vmem:[%s4518_s0 + $0x8] sm:$0xff]  ;;  %s4273_s30 = smov [#allocation8]  }
  0x1e   :  { %1489 = vmatprep.subr.bf16.mxu1 %v3636_v1  ;;  %v3640_v4 = vld [vmem:[#allocation3 + $0xc4] ss:$16 sps:$4 sm:$0xff]   ;;  %1449 = vmatpush1.bf16.msra.mxu0 %v3638_v2  ;;  %v3644_v6 = vld [vmem:[#allocation3 + $0xc0] ss:$16 sps:$4 sm:$0xff]   ;;  %v4323_v51 = vcombine.high %v54_v48, %v54_v48  ;;  %s3157_s7 = sshll.u32 %s4273_s30, 4  ;;  %s3158_s7 = int_to_ptr.vmem [resolvable:$true] %s3157_s7 }
  0x1f   :  { %1490 = vmatpush1.bf16.msra.mxu1 %v3639_v3  ;;  %v3642_v5 = vld [vmem:[#allocation3 + $0x2c4] ss:$16 sps:$4 sm:$0xff]   ;;  %1450 = vmatprep.subr.bf16.mxu0 %v3640_v4  ;;  %v3645_v7 = vld [vmem:[#allocation3 + $0x2c0] ss:$16 sps:$4 sm:$0xff]   ;;  %s4242_s8 = scalar_lea.vmem %s3158_s7, 128  ;;  %p4247_p11 = scmp.lt.s32.totalorder %s3158_s7, %s3158_s7 }
  0x20   :  { %1491 = vmatprep.subr.bf16.mxu1 %v3642_v5  ;;  %v3646_v8 = vld [vmem:[#allocation3 + $0xa4] ss:$16 sps:$4 sm:$0xff]   ;;  %v3650_v10 = vld [vmem:[#allocation3 + $0xa0] ss:$16 sps:$4 sm:$0xff]   ;;  %1521 = vmatprep.mubr.bf16.mxu1 %v4323_v51  ;;  %p4243_p10 = scmp.ne.s32.totalorder %s3158_s7, %s4242_s8  ;;  %p4248_p12 = scmp.lt.s32.totalorder %s4242_s8, %s4242_s8 }
  0x21   :  { %v3648_v9 = vld [vmem:[#allocation3 + $0x2a4] ss:$16 sps:$4 sm:$0xff]   ;;  %v3651_v11 = vld [vmem:[#allocation3 + $0x2a0] ss:$16 sps:$4 sm:$0xff]  }
  0x22   :  { %1451 = vmatpush1.bf16.msra.mxu0 %v3644_v6  ;;  %v3652_v12 = vld [vmem:[#allocation3 + $0x84] ss:$16 sps:$4 sm:$0xff]   ;;  %v3656_v14 = vld [vmem:[#allocation3 + $0x80] ss:$16 sps:$4 sm:$0xff]   ;;  %p4249_p13 = por %p4248_p12, %p4247_p11 }
  0x23   :  { %1492 = vmatpush1.bf16.msra.mxu1 %v3645_v7  ;;  %1452 = vmatprep.subr.bf16.mxu0 %v3646_v8  ;;  %v3654_v13 = vld [vmem:[#allocation3 + $0x284] ss:$16 sps:$4 sm:$0xff]   ;;  %v3657_v15 = vld [vmem:[#allocation3 + $0x280] ss:$16 sps:$4 sm:$0xff]   ;;  %v4329_v7 = vcombine.low %v54_v48, %v54_v48  ;;  %v3794_v48 = vld [vmem:[#allocation3 + $0xcc] ss:$16 sps:$4 sm:$0xff]  }
  0x24   :  { %1493 = vmatprep.subr.bf16.mxu1 %v3648_v9  ;;  %v3658_v16 = vld [vmem:[#allocation3 + $0x64] ss:$16 sps:$4 sm:$0xff]   ;;  %v3662_v18 = vld [vmem:[#allocation3 + $0x60] ss:$16 sps:$4 sm:$0xff]   ;;  %p4250_p0 = pnand %p4249_p13, %p4243_p10 }
  0x25   :  { %v3660_v17 = vld [vmem:[#allocation3 + $0x264] ss:$16 sps:$4 sm:$0xff]   ;;  %v3663_v19 = vld [vmem:[#allocation3 + $0x260] ss:$16 sps:$4 sm:$0xff]  }
  0x26   :  { %1453 = vmatpush1.bf16.msra.mxu0 %v3650_v10  ;;  %v3664_v20 = vld [vmem:[#allocation3 + $0x44] ss:$16 sps:$4 sm:$0xff]   ;;  %v3668_v22 = vld [vmem:[#allocation3 + $0x40] ss:$16 sps:$4 sm:$0xff]  }
  0x27   :  { %1494 = vmatpush1.bf16.msra.mxu1 %v3651_v11  ;;  %1454 = vmatprep.subr.bf16.mxu0 %v3652_v12  ;;  %v3666_v21 = vld [vmem:[#allocation3 + $0x244] ss:$16 sps:$4 sm:$0xff]   ;;  %v3669_v23 = vld [vmem:[#allocation3 + $0x240] ss:$16 sps:$4 sm:$0xff]  }
  0x28   :  { %1495 = vmatprep.subr.bf16.mxu1 %v3654_v13  ;;  %v3670_v24 = vld [vmem:[#allocation3 + $0x24] ss:$16 sps:$4 sm:$0xff]   ;;  %v3674_v26 = vld [vmem:[#allocation3 + $0x20] ss:$16 sps:$4 sm:$0xff]  }
  0x29   :  { %v3672_v25 = vld [vmem:[#allocation3 + $0x224] ss:$16 sps:$4 sm:$0xff]   ;;  %v3675_v27 = vld [vmem:[#allocation3 + $0x220] ss:$16 sps:$4 sm:$0xff]  }
  0x2a   :  { %1455 = vmatpush1.bf16.msra.mxu0 %v3656_v14  ;;  %v3676_v28 = vld [vmem:[#allocation3 + $0x4] ss:$16 sps:$4 sm:$0xff]   ;;  %v3680_v30 = vld [vmem:[#allocation3] ss:$16 sps:$4 sm:$0xff]  }
  0x2b   :  { %1496 = vmatpush1.bf16.msra.mxu1 %v3657_v15  ;;  %1456 = vmatprep.subr.bf16.mxu0 %v3658_v16  ;;  %v3678_v29 = vld [vmem:[#allocation3 + $0x204] ss:$16 sps:$4 sm:$0xff]   ;;  %v3681_v31 = vld [vmem:[#allocation3 + $0x200] ss:$16 sps:$4 sm:$0xff]   ;;  %v4272_v16 = vmov 0  }
  0x2c   :  { %1497 = vmatprep.subr.bf16.mxu1 %v3660_v17  ;;  %v3682_v32 = vld [vmem:[#allocation3 + $0x1e4] ss:$16 sps:$4 sm:$0xff]   ;;  %v3686_v34 = vld [vmem:[#allocation3 + $0x1e0] ss:$16 sps:$4 sm:$0xff]  }
  0x2d   :  { %v3684_v33 = vld [vmem:[#allocation3 + $0x3e4] ss:$16 sps:$4 sm:$0xff]   ;;  %v3687_v35 = vld [vmem:[#allocation3 + $0x3e0] ss:$16 sps:$4 sm:$0xff]  }
  0x2e   :  { %1457 = vmatpush1.bf16.msra.mxu0 %v3662_v18  ;;  %v3688_v36 = vld [vmem:[#allocation3 + $0x1c4] ss:$16 sps:$4 sm:$0xff]   ;;  %v3692_v38 = vld [vmem:[#allocation3 + $0x1c0] ss:$16 sps:$4 sm:$0xff]  }
  0x2f   :  { %1498 = vmatpush1.bf16.msra.mxu1 %v3663_v19  ;;  %1458 = vmatprep.subr.bf16.mxu0 %v3664_v20  ;;  %v3690_v37 = vld [vmem:[#allocation3 + $0x3c4] ss:$16 sps:$4 sm:$0xff]   ;;  %v3693_v39 = vld [vmem:[#allocation3 + $0x3c0] ss:$16 sps:$4 sm:$0xff]  }
  0x30   :  { %1499 = vmatprep.subr.bf16.mxu1 %v3666_v21  ;;  %v3694_v40 = vld [vmem:[#allocation3 + $0x1a4] ss:$16 sps:$4 sm:$0xff]   ;;  %v3698_v42 = vld [vmem:[#allocation3 + $0x1a0] ss:$16 sps:$4 sm:$0xff]  }
  0x31   :  { %v3696_v41 = vld [vmem:[#allocation3 + $0x3a4] ss:$16 sps:$4 sm:$0xff]   ;;  %v3699_v43 = vld [vmem:[#allocation3 + $0x3a0] ss:$16 sps:$4 sm:$0xff]  }
  0x32   :  { %1459 = vmatpush1.bf16.msra.mxu0 %v3668_v22  ;;  %v3700_v44 = vld [vmem:[#allocation3 + $0x184] ss:$16 sps:$4 sm:$0xff]   ;;  %v3704_v49 = vld [vmem:[#allocation3 + $0x180] ss:$16 sps:$4 sm:$0xff]  }
  0x33   :  { %1500 = vmatpush1.bf16.msra.mxu1 %v3669_v23  ;;  %1460 = vmatprep.subr.bf16.mxu0 %v3670_v24  ;;  %v3702_v45 = vld [vmem:[#allocation3 + $0x384] ss:$16 sps:$4 sm:$0xff]   ;;  %v3705_v50 = vld [vmem:[#allocation3 + $0x380] ss:$16 sps:$4 sm:$0xff]  }
  0x34   :  { %1501 = vmatprep.subr.bf16.mxu1 %v3672_v25  ;;  %v53_v46 = vld [vmem:[%s4518_s0] sm:$0xff] }
  0x35   :  { %v4318_v47 = vcombine.high %v53_v46, %v53_v46  ;;  %v3706_v52 = vld [vmem:[#allocation3 + $0x164] ss:$16 sps:$4 sm:$0xff]   ;;  %v3710_v54 = vld [vmem:[#allocation3 + $0x160] ss:$16 sps:$4 sm:$0xff]   ;;  %v4327_v6 = vcombine.low %v53_v46, %v53_v46 }
  0x36   :  { %1461 = vmatpush1.bf16.msra.mxu0 %v3674_v26  ;;  %v3708_v53 = vld [vmem:[#allocation3 + $0x364] ss:$16 sps:$4 sm:$0xff]   ;;  %v3711_v55 = vld [vmem:[#allocation3 + $0x360] ss:$16 sps:$4 sm:$0xff]  }
  0x37   :  { %1502 = vmatpush1.bf16.msra.mxu1 %v3675_v27  ;;  %1462 = vmatprep.subr.bf16.mxu0 %v3676_v28  ;;  %v3712_v56 = vld [vmem:[#allocation3 + $0x144] ss:$16 sps:$4 sm:$0xff]   ;;  %v3716_v58 = vld [vmem:[#allocation3 + $0x140] ss:$16 sps:$4 sm:$0xff]  }
  0x38   :  { %1503 = vmatprep.subr.bf16.mxu1 %v3678_v29  ;;  %1480 = vmatprep.mubr.bf16.mxu0 %v4318_v47  ;;  %v3714_v57 = vld [vmem:[#allocation3 + $0x344] ss:$16 sps:$4 sm:$0xff]   ;;  %v3717_v59 = vld [vmem:[#allocation3 + $0x340] ss:$16 sps:$4 sm:$0xff]  }
  0x39   :  { %v3718_v60 = vld [vmem:[#allocation3 + $0x124] ss:$16 sps:$4 sm:$0xff]   ;;  %v3722_v62 = vld [vmem:[#allocation3 + $0x120] ss:$16 sps:$4 sm:$0xff]  }
  0x3a   :  { %1463 = vmatpush1.bf16.msra.mxu0 %v3680_v30  ;;  %v3720_v61 = vld [vmem:[#allocation3 + $0x324] ss:$16 sps:$4 sm:$0xff]   ;;  %v3723_v63 = vld [vmem:[#allocation3 + $0x320] ss:$16 sps:$4 sm:$0xff]  }
  0x3b   :  { %1504 = vmatpush1.bf16.msra.mxu1 %v3681_v31  ;;  %1464 = vmatprep.subr.bf16.mxu0 %v3682_v32  ;;  %v3724_v0 = vld [vmem:[#allocation3 + $0x104] ss:$16 sps:$4 sm:$0xff]   ;;  %v3728_v2 = vld [vmem:[#allocation3 + $0x100] ss:$16 sps:$4 sm:$0xff]  }
  0x3c   :  { %1505 = vmatprep.subr.bf16.mxu1 %v3684_v33  ;;  %v3726_v1 = vld [vmem:[#allocation3 + $0x304] ss:$16 sps:$4 sm:$0xff]   ;;  %v3729_v3 = vld [vmem:[#allocation3 + $0x300] ss:$16 sps:$4 sm:$0xff]  }
  0x3d   :  { %v3736_v4 = vld [vmem:[#allocation3 + $0x4e4] ss:$16 sps:$4 sm:$0xff]   ;;  %v3734_v8 = vld [vmem:[#allocation3 + $0x4e0] ss:$16 sps:$4 sm:$0xff]  }
  0x3e   :  { %1465 = vmatpush2.bf16.msra.mxu0 %v3686_v34  ;;  %v3739_v5 = vld [vmem:[#allocation3 + $0x6e4] ss:$16 sps:$4 sm:$0xff]   ;;  %v3737_v9 = vld [vmem:[#allocation3 + $0x6e0] ss:$16 sps:$4 sm:$0xff]  }
  0x3f   :  { %1506 = vmatpush2.bf16.msra.mxu1 %v3687_v35  ;;  %1466 = vmatprep.subr.bf16.mxu0 %v3688_v36  ;;  %v3742_v10 = vld [vmem:[#allocation3 + $0x4c4] ss:$16 sps:$4 sm:$0xff]   ;;  %v3740_v12 = vld [vmem:[#allocation3 + $0x4c0] ss:$16 sps:$4 sm:$0xff]  }
  0x40   :  { %1507 = vmatprep.subr.bf16.mxu1 %v3690_v37  ;;  %v3745_v11 = vld [vmem:[#allocation3 + $0x6c4] ss:$16 sps:$4 sm:$0xff]   ;;  %v3743_v13 = vld [vmem:[#allocation3 + $0x6c0] ss:$16 sps:$4 sm:$0xff]  }
  0x41   :  { %v3748_v14 = vld [vmem:[#allocation3 + $0x4a4] ss:$16 sps:$4 sm:$0xff]   ;;  %v3746_v17 = vld [vmem:[#allocation3 + $0x4a0] ss:$16 sps:$4 sm:$0xff]  }
  0x42   :  { %1467 = vmatpush2.bf16.msra.mxu0 %v3692_v38  ;;  %v3751_v15 = vld [vmem:[#allocation3 + $0x6a4] ss:$16 sps:$4 sm:$0xff]   ;;  %v3749_v18 = vld [vmem:[#allocation3 + $0x6a0] ss:$16 sps:$4 sm:$0xff]  }
  0x43   :  { %1508 = vmatpush2.bf16.msra.mxu1 %v3693_v39  ;;  %1468 = vmatprep.subr.bf16.mxu0 %v3694_v40  ;;  %v3754_v19 = vld [vmem:[#allocation3 + $0x484] ss:$16 sps:$4 sm:$0xff]   ;;  %v3752_v21 = vld [vmem:[#allocation3 + $0x480] ss:$16 sps:$4 sm:$0xff]  }
  0x44   :  { %1509 = vmatprep.subr.bf16.mxu1 %v3696_v41  ;;  %v3757_v20 = vld [vmem:[#allocation3 + $0x684] ss:$16 sps:$4 sm:$0xff]   ;;  %v3755_v22 = vld [vmem:[#allocation3 + $0x680] ss:$16 sps:$4 sm:$0xff]  }
  0x45   :  { %v3760_v23 = vld [vmem:[#allocation3 + $0x464] ss:$16 sps:$4 sm:$0xff]   ;;  %v3758_v25 = vld [vmem:[#allocation3 + $0x460] ss:$16 sps:$4 sm:$0xff]  }
  0x46   :  { %1469 = vmatpush2.bf16.msra.mxu0 %v3698_v42  ;;  %v3763_v24 = vld [vmem:[#allocation3 + $0x664] ss:$16 sps:$4 sm:$0xff]   ;;  %v3761_v26 = vld [vmem:[#allocation3 + $0x660] ss:$16 sps:$4 sm:$0xff]   ;;  %v3788_v42 = vld [vmem:[#allocation3 + $0xec] ss:$16 sps:$4 sm:$0xff]  }
  0x47   :  { %1510 = vmatpush2.bf16.msra.mxu1 %v3699_v43  ;;  %1470 = vmatprep.subr.bf16.mxu0 %v3700_v44  ;;  %v3766_v27 = vld [vmem:[#allocation3 + $0x444] ss:$16 sps:$4 sm:$0xff]   ;;  %v3764_v29 = vld [vmem:[#allocation3 + $0x440] ss:$16 sps:$4 sm:$0xff]   ;;  %v3785_v44 = vld [vmem:[%s4518_s0 + $0x18] ss:$0 sps:$4 sm:$0xff]  }
  0x48   :  { %1511 = vmatprep.subr.bf16.mxu1 %v3702_v45  ;;  %v3769_v28 = vld [vmem:[#allocation3 + $0x644] ss:$16 sps:$4 sm:$0xff]   ;;  %v3767_v30 = vld [vmem:[#allocation3 + $0x640] ss:$16 sps:$4 sm:$0xff]   ;;  %v3786_v45 = vld [vmem:[#allocation3 + $0xe8] ss:$16 sps:$4 sm:$0xff]  }
  0x49   :  { %v3772_v31 = vld [vmem:[#allocation3 + $0x424] ss:$16 sps:$4 sm:$0xff]   ;;  %v3770_v34 = vld [vmem:[#allocation3 + $0x420] ss:$16 sps:$4 sm:$0xff]  }
  0x4a   :  { %1471 = vmatpush2.bf16.msra.mxu0 %v3704_v49  ;;  %v3775_v32 = vld [vmem:[#allocation3 + $0x624] ss:$16 sps:$4 sm:$0xff]   ;;  %v3773_v36 = vld [vmem:[#allocation3 + $0x620] ss:$16 sps:$4 sm:$0xff]  }
  0x4b   :  { %1512 = vmatpush2.bf16.msra.mxu1 %v3705_v50  ;;  %1472 = vmatprep.subr.bf16.mxu0 %v3706_v52  ;;  %v4337_v33 = vld [vmem:[%s4518_s0 + $0x10] sm:$0xff]  ;;  %v3792_v50 = vld [vmem:[#allocation3 + $0xc8] ss:$16 sps:$4 sm:$0xff]  }
  0x4c   :  { %1513 = vmatprep.subr.bf16.mxu1 %v3708_v53  ;;  %v4341_v35 = vcombine.high %v4337_v33, %v4337_v33  ;;  %v3778_v37 = vld [vmem:[#allocation3 + $0x404] ss:$16 sps:$4 sm:$0xff]   ;;  %v3776_v39 = vld [vmem:[#allocation3 + $0x400] ss:$16 sps:$4 sm:$0xff]   ;;  %v3800_v53 = vld [vmem:[#allocation3 + $0xac] ss:$16 sps:$4 sm:$0xff]  }
  0x4d   :  { %v3781_v38 = vld [vmem:[#allocation3 + $0x604] ss:$16 sps:$4 sm:$0xff]   ;;  %v3779_v40 = vld [vmem:[#allocation3 + $0x600] ss:$16 sps:$4 sm:$0xff]  }
  0x4e   :  { %1473 = vmatpush2.bf16.msra.mxu0 %v3710_v54  ;;  %v3784_v41 = vld [vmem:[#allocation3 + $0x5e4] ss:$16 sps:$4 sm:$0xff]   ;;  %v3782_v43 = vld [vmem:[#allocation3 + $0x5e0] ss:$16 sps:$4 sm:$0xff]  }
  0x4f   :  { %1514 = vmatpush2.bf16.msra.mxu1 %v3711_v55  ;;  %1474 = vmatprep.subr.bf16.mxu0 %v3712_v56  ;;  %v3791_v46 = vld [vmem:[#allocation3 + $0x5c4] ss:$16 sps:$4 sm:$0xff]   ;;  %v3789_v49 = vld [vmem:[#allocation3 + $0x5c0] ss:$16 sps:$4 sm:$0xff]   ;;  %v3798_v55 = vld [vmem:[#allocation3 + $0xa8] ss:$16 sps:$4 sm:$0xff]  }
  0x50   :  { %1515 = vmatprep.subr.bf16.mxu1 %v3714_v57  ;;  %v3797_v52 = vld [vmem:[#allocation3 + $0x5a4] ss:$16 sps:$4 sm:$0xff]   ;;  %v3795_v54 = vld [vmem:[#allocation3 + $0x5a0] ss:$16 sps:$4 sm:$0xff]   ;;  %v3806_v57 = vld [vmem:[#allocation3 + $0x8c] ss:$16 sps:$4 sm:$0xff]  }
  0x51   :  { %v3803_v56 = vld [vmem:[#allocation3 + $0x584] ss:$16 sps:$4 sm:$0xff]  }
  0x52   :  { %1475 = vmatpush2.bf16.msra.mxu0 %v3716_v58  ;;  %v3801_v58 = vld [vmem:[#allocation3 + $0x580] ss:$16 sps:$4 sm:$0xff]  }
  0x53   :  { %1516 = vmatpush2.bf16.msra.mxu1 %v3717_v59  ;;  %1476 = vmatprep.subr.bf16.mxu0 %v3718_v60  ;;  %v3804_v59 = vld [vmem:[#allocation3 + $0x88] ss:$16 sps:$4 sm:$0xff]   ;;  %v3809_v60 = vld [vmem:[#allocation3 + $0x564] ss:$16 sps:$4 sm:$0xff]  }
  0x54   :  { %1517 = vmatprep.subr.bf16.mxu1 %v3720_v61  ;;  %v3812_v61 = vld [vmem:[#allocation3 + $0x6c] ss:$16 sps:$4 sm:$0xff]  }
  0x56   :  { %1477 = vmatpush2.bf16.msra.mxu0 %v3722_v62  ;;  %v3807_v62 = vld [vmem:[#allocation3 + $0x560] ss:$16 sps:$4 sm:$0xff]  }
  0x57   :  { %1518 = vmatpush2.bf16.msra.mxu1 %v3723_v63  ;;  %1478 = vmatprep.subr.bf16.mxu0 %v3724_v0  ;;  %v3815_v63 = vld [vmem:[#allocation3 + $0x544] ss:$16 sps:$4 sm:$0xff]   ;;  %v3818_v0 = vld [vmem:[#allocation3 + $0x4c] ss:$16 sps:$4 sm:$0xff]  }
  0x58   :  { %1519 = vmatprep.subr.bf16.mxu1 %v3726_v1  ;;  %v3813_v1 = vld [vmem:[#allocation3 + $0x540] ss:$16 sps:$4 sm:$0xff]  }
  0x5a   :  { %1479 = vmatpush2.bf16.msra.mxu0 %v3728_v2  ;;  %v3816_v2 = vld [vmem:[#allocation3 + $0x48] ss:$16 sps:$4 sm:$0xff]  }
  0x5b   :  { %1520 = vmatpush2.bf16.msra.mxu1 %v3729_v3  ;;  %1530 = vmatprep.subr.bf16.mxu0 %v3736_v4  ;;  %v3821_v3 = vld [vmem:[#allocation3 + $0x524] ss:$16 sps:$4 sm:$0xff]   ;;  %v3824_v4 = vld [vmem:[#allocation3 + $0x2c] ss:$16 sps:$4 sm:$0xff]  }
  0x5c   :  { %1571 = vmatprep.subr.bf16.mxu1 %v3739_v5  ;;  %v3819_v5 = vld [vmem:[#allocation3 + $0x520] ss:$16 sps:$4 sm:$0xff]  }
  0x5d   :  { %1481 = vmatmul.mubr.bf16.vlgmr.msra.gmra.mxu0 %v4327_v6 }
  0x5e   :  { %1522 = vmatmul.mubr.bf16.vlgmr.msra.gmra.mxu1 %v4329_v7  ;;  %1531 = vmatpush1.bf16.msra.mxu0 %v3734_v8  ;;  %v3822_v8 = vld [vmem:[#allocation3 + $0x28] ss:$16 sps:$4 sm:$0xff]  }
  0x5f   :  { %1572 = vmatpush1.bf16.msra.mxu1 %v3737_v9  ;;  %1532 = vmatprep.subr.bf16.mxu0 %v3742_v10  ;;  %v3827_v9 = vld [vmem:[#allocation3 + $0x504] ss:$16 sps:$4 sm:$0xff]   ;;  %v3830_v10 = vld [vmem:[#allocation3 + $0xc] ss:$16 sps:$4 sm:$0xff]  }
  0x60   :  { %1573 = vmatprep.subr.bf16.mxu1 %v3745_v11  ;;  %1603 = vmatprep.mubr.bf16.mxu1 %v4272_v16  ;;  %v3825_v11 = vld [vmem:[#allocation3 + $0x500] ss:$16 sps:$4 sm:$0xff]  }
  0x61   :  { %1562 = vmatprep.mubr.bf16.mxu0 %v4341_v35 }
  0x62   :  { %1533 = vmatpush1.bf16.msra.mxu0 %v3740_v12  ;;  %v3828_v12 = vld [vmem:[#allocation3 + $0x8] ss:$16 sps:$4 sm:$0xff]  }
  0x63   :  { %1574 = vmatpush1.bf16.msra.mxu1 %v3743_v13  ;;  %1534 = vmatprep.subr.bf16.mxu0 %v3748_v14  ;;  %v3835_v13 = vld [vmem:[#allocation3 + $0x1ec] ss:$16 sps:$4 sm:$0xff]  }
  0x64   :  { %1575 = vmatprep.subr.bf16.mxu1 %v3751_v15  ;;  %v3838_v14 = vld [vmem:[#allocation3 + $0x2ec] ss:$16 sps:$4 sm:$0xff]   ;;  %v4350_v15 = vcombine.low %v4337_v33, %v4337_v33  ;;  %v3857_v33 = vld [vmem:[#allocation3 + $0x168] ss:$16 sps:$4 sm:$0xff]  }
  0x66   :  { %1535 = vmatpush1.bf16.msra.mxu0 %v3746_v17  ;;  %v3833_v17 = vld [vmem:[#allocation3 + $0x1e8] ss:$16 sps:$4 sm:$0xff]  }
  0x67   :  { %1576 = vmatpush1.bf16.msra.mxu1 %v3749_v18  ;;  %1536 = vmatprep.subr.bf16.mxu0 %v3754_v19  ;;  %v3836_v18 = vld [vmem:[#allocation3 + $0x2e8] ss:$16 sps:$4 sm:$0xff]   ;;  %v3841_v19 = vld [vmem:[#allocation3 + $0x1cc] ss:$16 sps:$4 sm:$0xff]  }
  0x68   :  { %1577 = vmatprep.subr.bf16.mxu1 %v3757_v20  ;;  %v3844_v20 = vld [vmem:[#allocation3 + $0x2cc] ss:$16 sps:$4 sm:$0xff]  }
  0x6a   :  { %1537 = vmatpush1.bf16.msra.mxu0 %v3752_v21  ;;  %v3839_v21 = vld [vmem:[#allocation3 + $0x1c8] ss:$16 sps:$4 sm:$0xff]  }
  0x6b   :  { %1578 = vmatpush1.bf16.msra.mxu1 %v3755_v22  ;;  %1538 = vmatprep.subr.bf16.mxu0 %v3760_v23  ;;  %v3842_v22 = vld [vmem:[#allocation3 + $0x2c8] ss:$16 sps:$4 sm:$0xff]   ;;  %v3847_v23 = vld [vmem:[#allocation3 + $0x1ac] ss:$16 sps:$4 sm:$0xff]  }
  0x6c   :  { %1579 = vmatprep.subr.bf16.mxu1 %v3763_v24  ;;  %v3850_v24 = vld [vmem:[#allocation3 + $0x2ac] ss:$16 sps:$4 sm:$0xff]  }
  0x6e   :  { %1539 = vmatpush1.bf16.msra.mxu0 %v3758_v25  ;;  %v3845_v25 = vld [vmem:[#allocation3 + $0x1a8] ss:$16 sps:$4 sm:$0xff]  }
  0x6f   :  { %1580 = vmatpush1.bf16.msra.mxu1 %v3761_v26  ;;  %1540 = vmatprep.subr.bf16.mxu0 %v3766_v27  ;;  %v3848_v26 = vld [vmem:[#allocation3 + $0x2a8] ss:$16 sps:$4 sm:$0xff]   ;;  %v3853_v27 = vld [vmem:[#allocation3 + $0x18c] ss:$16 sps:$4 sm:$0xff]  }
  0x70   :  { %1581 = vmatprep.subr.bf16.mxu1 %v3769_v28  ;;  %v3856_v28 = vld [vmem:[#allocation3 + $0x28c] ss:$16 sps:$4 sm:$0xff]  }
  0x72   :  { %1541 = vmatpush1.bf16.msra.mxu0 %v3764_v29  ;;  %v3851_v29 = vld [vmem:[#allocation3 + $0x188] ss:$16 sps:$4 sm:$0xff]  }
  0x73   :  { %1582 = vmatpush1.bf16.msra.mxu1 %v3767_v30  ;;  %1542 = vmatprep.subr.bf16.mxu0 %v3772_v31  ;;  %v3854_v30 = vld [vmem:[#allocation3 + $0x288] ss:$16 sps:$4 sm:$0xff]   ;;  %v3859_v31 = vld [vmem:[#allocation3 + $0x16c] ss:$16 sps:$4 sm:$0xff]  }
  0x74   :  { %1583 = vmatprep.subr.bf16.mxu1 %v3775_v32  ;;  %v3862_v32 = vld [vmem:[#allocation3 + $0x26c] ss:$16 sps:$4 sm:$0xff]  }
  0x76   :  { %1543 = vmatpush1.bf16.msra.mxu0 %v3770_v34  ;;  %v3865_v34 = vld [vmem:[#allocation3 + $0x14c] ss:$16 sps:$4 sm:$0xff]  }
  0x77   :  { %1584 = vmatpush1.bf16.msra.mxu1 %v3773_v36  ;;  %1544 = vmatprep.subr.bf16.mxu0 %v3778_v37  ;;  %v3868_v36 = vld [vmem:[#allocation3 + $0x24c] ss:$16 sps:$4 sm:$0xff]   ;;  %v3863_v37 = vld [vmem:[#allocation3 + $0x148] ss:$16 sps:$4 sm:$0xff]  }
  0x78   :  { %1585 = vmatprep.subr.bf16.mxu1 %v3781_v38  ;;  %v3866_v38 = vld [vmem:[#allocation3 + $0x248] ss:$16 sps:$4 sm:$0xff]  }
  0x7a   :  { %1545 = vmatpush1.bf16.msra.mxu0 %v3776_v39  ;;  %v3871_v39 = vld [vmem:[#allocation3 + $0x12c] ss:$16 sps:$4 sm:$0xff]  }
  0x7b   :  { %1586 = vmatpush1.bf16.msra.mxu1 %v3779_v40  ;;  %1546 = vmatprep.subr.bf16.mxu0 %v3784_v41  ;;  %v3874_v40 = vld [vmem:[#allocation3 + $0x22c] ss:$16 sps:$4 sm:$0xff]   ;;  %v3869_v41 = vld [vmem:[#allocation3 + $0x128] ss:$16 sps:$4 sm:$0xff]  }
  0x7c   :  { %1612 = vmatprep.subr.bf16.mxu1 %v3788_v42  ;;  %v3872_v42 = vld [vmem:[#allocation3 + $0x228] ss:$16 sps:$4 sm:$0xff]  }
  0x7e   :  { %1604 = vmatmul.mubr.bf16.vlgmr.msra.gmra.mxu1 %v3785_v44  ;;  %1547 = vmatpush2.bf16.msra.mxu0 %v3782_v43  ;;  %v3877_v43 = vld [vmem:[#allocation3 + $0x10c] ss:$16 sps:$4 sm:$0xff]  }
  0x7f   :  { %1613 = vmatpush1.bf16.msra.mxu1 %v3786_v45  ;;  %1548 = vmatprep.subr.bf16.mxu0 %v3791_v46  ;;  %v3880_v44 = vld [vmem:[#allocation3 + $0x20c] ss:$16 sps:$4 sm:$0xff]   ;;  %v3875_v45 = vld [vmem:[#allocation3 + $0x108] ss:$16 sps:$4 sm:$0xff]  }
  0x80   :  { %1614 = vmatprep.subr.bf16.mxu1 %v3794_v48  ;;  %1644 = vmatprep.mubr.bf16.mxu1 %v4318_v47  ;;  %v3810_v47 = vld [vmem:[#allocation3 + $0x68] ss:$16 sps:$4 sm:$0xff]   ;;  %v3883_v48 = vld [vmem:[#allocation3 + $0x3ec] ss:$16 sps:$4 sm:$0xff]  }
  0x81   :  { %v3878_v46 = vld [vmem:[#allocation3 + $0x208] ss:$16 sps:$4 sm:$0xff]  }
  0x82   :  { %1549 = vmatpush2.bf16.msra.mxu0 %v3789_v49  ;;  %v3886_v49 = vld [vmem:[#allocation3 + $0x4ec] ss:$16 sps:$4 sm:$0xff]  }
  0x83   :  { %1615 = vmatpush1.bf16.msra.mxu1 %v3792_v50  ;;  %1550 = vmatprep.subr.bf16.mxu0 %v3797_v52  ;;  %v3881_v50 = vld [vmem:[#allocation3 + $0x3e8] ss:$16 sps:$4 sm:$0xff]  }
  0x84   :  { %1616 = vmatprep.subr.bf16.mxu1 %v3800_v53  ;;  %v3884_v52 = vld [vmem:[#allocation3 + $0x4e8] ss:$16 sps:$4 sm:$0xff]   ;;  %v3889_v53 = vld [vmem:[#allocation3 + $0x3cc] ss:$16 sps:$4 sm:$0xff]  }
  0x86   :  { %1551 = vmatpush2.bf16.msra.mxu0 %v3795_v54  ;;  %v3892_v54 = vld [vmem:[#allocation3 + $0x4cc] ss:$16 sps:$4 sm:$0xff]  }
  0x87   :  { %1617 = vmatpush1.bf16.msra.mxu1 %v3798_v55  ;;  %1552 = vmatprep.subr.bf16.mxu0 %v3803_v56  ;;  %v3887_v55 = vld [vmem:[#allocation3 + $0x3c8] ss:$16 sps:$4 sm:$0xff]  }
  0x88   :  { %1618 = vmatprep.subr.bf16.mxu1 %v3806_v57  ;;  %v3890_v56 = vld [vmem:[#allocation3 + $0x4c8] ss:$16 sps:$4 sm:$0xff]   ;;  %v3895_v57 = vld [vmem:[#allocation3 + $0x3ac] ss:$16 sps:$4 sm:$0xff]  }
  0x8a   :  { %1553 = vmatpush2.bf16.msra.mxu0 %v3801_v58  ;;  %v3898_v58 = vld [vmem:[#allocation3 + $0x4ac] ss:$16 sps:$4 sm:$0xff]  }
  0x8b   :  { %1619 = vmatpush1.bf16.msra.mxu1 %v3804_v59  ;;  %1554 = vmatprep.subr.bf16.mxu0 %v3809_v60  ;;  %v3893_v59 = vld [vmem:[#allocation3 + $0x3a8] ss:$16 sps:$4 sm:$0xff]  }
  0x8c   :  { %1620 = vmatprep.subr.bf16.mxu1 %v3812_v61  ;;  %v3896_v60 = vld [vmem:[#allocation3 + $0x4a8] ss:$16 sps:$4 sm:$0xff]   ;;  %v3901_v61 = vld [vmem:[#allocation3 + $0x38c] ss:$16 sps:$4 sm:$0xff]  }
  0x8e   :  { %1555 = vmatpush2.bf16.msra.mxu0 %v3807_v62  ;;  %v3904_v62 = vld [vmem:[#allocation3 + $0x48c] ss:$16 sps:$4 sm:$0xff]  }
  0x8f   :  { %1621 = vmatpush1.bf16.msra.mxu1 %v3810_v47  ;;  %1556 = vmatprep.subr.bf16.mxu0 %v3815_v63  ;;  %v3899_v47 = vld [vmem:[#allocation3 + $0x388] ss:$16 sps:$4 sm:$0xff]   ;;  %v3907_v63 = vld [vmem:[#allocation3 + $0x36c] ss:$16 sps:$4 sm:$0xff]  }
  0x90   :  { %1622 = vmatprep.subr.bf16.mxu1 %v3818_v0  ;;  %v3910_v0 = vld [vmem:[#allocation3 + $0x46c] ss:$16 sps:$4 sm:$0xff]  }
  0x92   :  { %1557 = vmatpush2.bf16.msra.mxu0 %v3813_v1  ;;  %v3905_v1 = vld [vmem:[#allocation3 + $0x368] ss:$16 sps:$4 sm:$0xff]  }
  0x93   :  { %1623 = vmatpush1.bf16.msra.mxu1 %v3816_v2  ;;  %1558 = vmatprep.subr.bf16.mxu0 %v3821_v3  ;;  %v3908_v2 = vld [vmem:[#allocation3 + $0x468] ss:$16 sps:$4 sm:$0xff]   ;;  %v3913_v3 = vld [vmem:[#allocation3 + $0x34c] ss:$16 sps:$4 sm:$0xff]  }
  0x94   :  { %1624 = vmatprep.subr.bf16.mxu1 %v3824_v4  ;;  %v3916_v4 = vld [vmem:[#allocation3 + $0x44c] ss:$16 sps:$4 sm:$0xff]  }
  0x96   :  { %1559 = vmatpush2.bf16.msra.mxu0 %v3819_v5  ;;  %v3914_v5 = vld [vmem:[#allocation3 + $0x448] ss:$16 sps:$4 sm:$0xff]  }
  0x97   :  { %1625 = vmatpush1.bf16.msra.mxu1 %v3822_v8  ;;  %1560 = vmatprep.subr.bf16.mxu0 %v3827_v9  ;;  %v3919_v8 = vld [vmem:[#allocation3 + $0x32c] ss:$16 sps:$4 sm:$0xff]  }
  0x98   :  { %1626 = vmatprep.subr.bf16.mxu1 %v3830_v10  ;;  %v3922_v9 = vld [vmem:[#allocation3 + $0x42c] ss:$16 sps:$4 sm:$0xff]   ;;  %v3917_v10 = vld [vmem:[#allocation3 + $0x328] ss:$16 sps:$4 sm:$0xff]  }
  0x9a   :  { %1561 = vmatpush2.bf16.msra.mxu0 %v3825_v11  ;;  %v3920_v11 = vld [vmem:[#allocation3 + $0x428] ss:$16 sps:$4 sm:$0xff]  }
  0x9b   :  { %1627 = vmatpush1.bf16.msra.mxu1 %v3828_v12  ;;  %1653 = vmatprep.subr.bf16.mxu0 %v3838_v14  ;;  %v3925_v12 = vld [vmem:[#allocation3 + $0x30c] ss:$16 sps:$4 sm:$0xff]   ;;  %v3923_v14 = vld [vmem:[#allocation3 + $0x308] ss:$16 sps:$4 sm:$0xff]  }
  0x9c   :  { %1628 = vmatprep.subr.bf16.mxu1 %v3835_v13  ;;  %v3928_v13 = vld [vmem:[#allocation3 + $0x40c] ss:$16 sps:$4 sm:$0xff]  }
  0x9d   :  { %1563 = vmatmul.mubr.bf16.vlgmr.msra.gmra.mxu0 %v4350_v15 }
  0x9e   :  { %1654 = vmatpush1.bf16.msra.mxu0 %v3836_v18  ;;  %1685 = vmatprep.mubr.bf16.mxu0 %v4323_v51  ;;  %v3860_v51 = vld [vmem:[#allocation3 + $0x268] ss:$16 sps:$4 sm:$0xff]   ;;  %v3931_v18 = vld [vmem:[#allocation3 + $0x5ec] ss:$16 sps:$4 sm:$0xff]  }
  0x9f   :  { %1629 = vmatpush2.bf16.msra.mxu1 %v3833_v17  ;;  %1655 = vmatprep.subr.bf16.mxu0 %v3844_v20  ;;  %v3926_v17 = vld [vmem:[#allocation3 + $0x408] ss:$16 sps:$4 sm:$0xff]  }
  0xa0   :  { %1630 = vmatprep.subr.bf16.mxu1 %v3841_v19  ;;  %v3934_v19 = vld [vmem:[#allocation3 + $0x6ec] ss:$16 sps:$4 sm:$0xff]   ;;  %v3929_v20 = vld [vmem:[#allocation3 + $0x5e8] ss:$16 sps:$4 sm:$0xff]  }
  0xa2   :  { %1656 = vmatpush1.bf16.msra.mxu0 %v3842_v22  ;;  %v3937_v22 = vld [vmem:[#allocation3 + $0x5cc] ss:$16 sps:$4 sm:$0xff]  }
  0xa3   :  { %1631 = vmatpush2.bf16.msra.mxu1 %v3839_v21  ;;  %1657 = vmatprep.subr.bf16.mxu0 %v3850_v24  ;;  %v3932_v21 = vld [vmem:[#allocation3 + $0x6e8] ss:$16 sps:$4 sm:$0xff]  }
  0xa4   :  { %1632 = vmatprep.subr.bf16.mxu1 %v3847_v23  ;;  %v3940_v23 = vld [vmem:[#allocation3 + $0x6cc] ss:$16 sps:$4 sm:$0xff]   ;;  %v3935_v24 = vld [vmem:[#allocation3 + $0x5c8] ss:$16 sps:$4 sm:$0xff]  }
  0xa6   :  { %1658 = vmatpush1.bf16.msra.mxu0 %v3848_v26  ;;  %v3943_v26 = vld [vmem:[#allocation3 + $0x5ac] ss:$16 sps:$4 sm:$0xff]  }
  0xa7   :  { %1633 = vmatpush2.bf16.msra.mxu1 %v3845_v25  ;;  %1659 = vmatprep.subr.bf16.mxu0 %v3856_v28  ;;  %v3938_v25 = vld [vmem:[#allocation3 + $0x6c8] ss:$16 sps:$4 sm:$0xff]  }
  0xa8   :  { %1634 = vmatprep.subr.bf16.mxu1 %v3853_v27  ;;  %v3946_v27 = vld [vmem:[#allocation3 + $0x6ac] ss:$16 sps:$4 sm:$0xff]   ;;  %v3941_v28 = vld [vmem:[#allocation3 + $0x5a8] ss:$16 sps:$4 sm:$0xff]  }
  0xaa   :  { %1660 = vmatpush1.bf16.msra.mxu0 %v3854_v30  ;;  %v3949_v30 = vld [vmem:[#allocation3 + $0x58c] ss:$16 sps:$4 sm:$0xff]  }
  0xab   :  { %1635 = vmatpush2.bf16.msra.mxu1 %v3851_v29  ;;  %1661 = vmatprep.subr.bf16.mxu0 %v3862_v32  ;;  %v3944_v29 = vld [vmem:[#allocation3 + $0x6a8] ss:$16 sps:$4 sm:$0xff]  }
  0xac   :  { %1636 = vmatprep.subr.bf16.mxu1 %v3859_v31  ;;  %v3952_v31 = vld [vmem:[#allocation3 + $0x68c] ss:$16 sps:$4 sm:$0xff]   ;;  %v3947_v32 = vld [vmem:[#allocation3 + $0x588] ss:$16 sps:$4 sm:$0xff]  }
  0xae   :  { %1662 = vmatpush1.bf16.msra.mxu0 %v3860_v51  ;;  %v3958_v51 = vld [vmem:[#allocation3 + $0x66c] ss:$16 sps:$4 sm:$0xff]  }
  0xaf   :  { %1637 = vmatpush2.bf16.msra.mxu1 %v3857_v33  ;;  %1663 = vmatprep.subr.bf16.mxu0 %v3868_v36  ;;  %v3950_v33 = vld [vmem:[#allocation3 + $0x688] ss:$16 sps:$4 sm:$0xff]  }
  0xb0   :  { %1638 = vmatprep.subr.bf16.mxu1 %v3865_v34  ;;  %v3953_v34 = vld [vmem:[#allocation3 + $0x568] ss:$16 sps:$4 sm:$0xff]  }
  0xb1   :  { %v3956_v36 = vld [vmem:[#allocation3 + $0x668] ss:$16 sps:$4 sm:$0xff]  }
  0xb2   :  { %1664 = vmatpush1.bf16.msra.mxu0 %v3866_v38  ;;  %v3959_v38 = vld [vmem:[#allocation3 + $0x548] ss:$16 sps:$4 sm:$0xff]  }
  0xb3   :  { %1639 = vmatpush2.bf16.msra.mxu1 %v3863_v37  ;;  %1665 = vmatprep.subr.bf16.mxu0 %v3874_v40  ;;  %v3961_v37 = vld [vmem:[#allocation3 + $0x54c] ss:$16 sps:$4 sm:$0xff]  }
  0xb4   :  { %1640 = vmatprep.subr.bf16.mxu1 %v3871_v39  ;;  %v3962_v39 = vld [vmem:[#allocation3 + $0x648] ss:$16 sps:$4 sm:$0xff]   ;;  %v3967_v40 = vld [vmem:[#allocation3 + $0x52c] ss:$16 sps:$4 sm:$0xff]  }
  0xb6   :  { %1666 = vmatpush1.bf16.msra.mxu0 %v3872_v42  ;;  %v3965_v42 = vld [vmem:[#allocation3 + $0x528] ss:$16 sps:$4 sm:$0xff]  }
  0xb7   :  { %1641 = vmatpush2.bf16.msra.mxu1 %v3869_v41  ;;  %1667 = vmatprep.subr.bf16.mxu0 %v3880_v44  ;;  %v3970_v41 = vld [vmem:[#allocation3 + $0x62c] ss:$16 sps:$4 sm:$0xff]  }
  0xb8   :  { %1642 = vmatprep.subr.bf16.mxu1 %v3877_v43  ;;  %v3968_v43 = vld [vmem:[#allocation3 + $0x628] ss:$16 sps:$4 sm:$0xff]   ;;  %v3973_v44 = vld [vmem:[#allocation3 + $0x50c] ss:$16 sps:$4 sm:$0xff]  }
  0xba   :  { %1668 = vmatpush1.bf16.msra.mxu0 %v3878_v46  ;;  %v3971_v46 = vld [vmem:[#allocation3 + $0x508] ss:$16 sps:$4 sm:$0xff]  }
  0xbb   :  { %1643 = vmatpush2.bf16.msra.mxu1 %v3875_v45  ;;  %1669 = vmatprep.subr.bf16.mxu0 %v3883_v48  ;;  %v3976_v45 = vld [vmem:[#allocation3 + $0x60c] ss:$16 sps:$4 sm:$0xff]   ;;  %v3974_v48 = vld [vmem:[#allocation3 + $0x608] ss:$16 sps:$4 sm:$0xff]  }
  0xbc   :  { %1694 = vmatprep.subr.bf16.mxu1 %v3886_v49  ;;  %v3979_v49 = vld [vmem:[#allocation6 + $0xe4] ss:$16 sps:$4 sm:$0xff]  }
  0xbe   :  { %1645 = vmatmul.mubr.bf16.vlgmr.msra.gmra.mxu1 %v4327_v6  ;;  %1670 = vmatpush2.bf16.msra.mxu0 %v3881_v50  ;;  %v3902_v6 = vld [vmem:[#allocation3 + $0x488] ss:$16 sps:$4 sm:$0xff]   ;;  %v3977_v50 = vld [vmem:[#allocation6 + $0xe0] ss:$16 sps:$4 sm:$0xff]  }
  0xbf   :  { %1695 = vmatpush1.bf16.msra.mxu1 %v3884_v52  ;;  %1671 = vmatprep.subr.bf16.mxu0 %v3889_v53  ;;  %v3982_v52 = vld [vmem:[#allocation6 + $0xc4] ss:$16 sps:$4 sm:$0xff]   ;;  %v4201_v53 = vld [vmem:[%s4518_s0 + $0x18] ss:$0 sps:$4 sm:$0xff]  }
  0xc0   :  { %1696 = vmatprep.subr.bf16.mxu1 %v3892_v54  ;;  %1726 = vmatprep.mubr.bf16.mxu1 %v4341_v35  ;;  %v3911_v35 = vld [vmem:[#allocation3 + $0x348] ss:$16 sps:$4 sm:$0xff]   ;;  %v3980_v54 = vld [vmem:[#allocation6 + $0xc0] ss:$16 sps:$4 sm:$0xff]  }
  0xc2   :  { %1672 = vmatpush2.bf16.msra.mxu0 %v3887_v55  ;;  %v3985_v55 = vld [vmem:[#allocation6 + $0xa4] ss:$16 sps:$4 sm:$0xff]  }
  0xc3   :  { %1697 = vmatpush1.bf16.msra.mxu1 %v3890_v56  ;;  %1673 = vmatprep.subr.bf16.mxu0 %v3895_v57  ;;  %v3983_v56 = vld [vmem:[#allocation6 + $0xa0] ss:$16 sps:$4 sm:$0xff]   ;;  %v3988_v57 = vld [vmem:[#allocation6 + $0x84] ss:$16 sps:$4 sm:$0xff]  }
  0xc4   :  { %1698 = vmatprep.subr.bf16.mxu1 %v3898_v58  ;;  %v3986_v58 = vld [vmem:[#allocation6 + $0x80] ss:$16 sps:$4 sm:$0xff]  }
  0xc6   :  { %1674 = vmatpush2.bf16.msra.mxu0 %v3893_v59  ;;  %v4049_v59 = vld [vmem:[#allocation6 + $0x2e0] ss:$16 sps:$4 sm:$0xff]  }
  0xc7   :  { %1699 = vmatpush1.bf16.msra.mxu1 %v3896_v60  ;;  %1675 = vmatprep.subr.bf16.mxu0 %v3901_v61  ;;  %v4051_v60 = vld [vmem:[#allocation6 + $0x2e4] ss:$16 sps:$4 sm:$0xff]  }
  0xc8   :  { %1700 = vmatprep.subr.bf16.mxu1 %v3904_v62  ;;  %v3991_v61 = vld [vmem:[#allocation6 + $0x64] ss:$16 sps:$4 sm:$0xff]   ;;  %v4055_v62 = vld [vmem:[#allocation6 + $0x2c0] ss:$16 sps:$4 sm:$0xff]  }
  0xca   :  { %1676 = vmatpush2.bf16.msra.mxu0 %v3899_v47  ;;  %v4057_v47 = vld [vmem:[#allocation6 + $0x2c4] ss:$16 sps:$4 sm:$0xff]  }
  0xcb   :  { %1701 = vmatpush1.bf16.msra.mxu1 %v3902_v6  ;;  %1677 = vmatprep.subr.bf16.mxu0 %v3907_v63  ;;  %v3994_v6 = vld [vmem:[#allocation6 + $0x44] ss:$16 sps:$4 sm:$0xff]   ;;  %v3992_v63 = vld [vmem:[#allocation6 + $0x40] ss:$16 sps:$4 sm:$0xff]  }
  0xcc   :  { %1702 = vmatprep.subr.bf16.mxu1 %v3910_v0  ;;  %v4061_v0 = vld [vmem:[#allocation6 + $0x2a0] ss:$16 sps:$4 sm:$0xff]  }
  0xce   :  { %1678 = vmatpush2.bf16.msra.mxu0 %v3905_v1  ;;  %v4063_v1 = vld [vmem:[#allocation6 + $0x2a4] ss:$16 sps:$4 sm:$0xff]  }
  0xcf   :  { %1703 = vmatpush1.bf16.msra.mxu1 %v3908_v2  ;;  %1679 = vmatprep.subr.bf16.mxu0 %v3913_v3  ;;  %v3997_v2 = vld [vmem:[#allocation6 + $0x24] ss:$16 sps:$4 sm:$0xff]   ;;  %v3995_v3 = vld [vmem:[#allocation6 + $0x20] ss:$16 sps:$4 sm:$0xff]  }
  0xd0   :  { %1704 = vmatprep.subr.bf16.mxu1 %v3916_v4  ;;  %v4067_v4 = vld [vmem:[#allocation6 + $0x280] ss:$16 sps:$4 sm:$0xff]  }
  0xd2   :  { %1680 = vmatpush2.bf16.msra.mxu0 %v3911_v35  ;;  %v4069_v35 = vld [vmem:[#allocation6 + $0x284] ss:$16 sps:$4 sm:$0xff]  }
  0xd3   :  { %1705 = vmatpush1.bf16.msra.mxu1 %v3914_v5  ;;  %1681 = vmatprep.subr.bf16.mxu0 %v3919_v8  ;;  %v4000_v5 = vld [vmem:[#allocation6 + $0x4] ss:$16 sps:$4 sm:$0xff]   ;;  %v3998_v8 = vld [vmem:[#allocation6] ss:$16 sps:$4 sm:$0xff]  }
  0xd4   :  { %1706 = vmatprep.subr.bf16.mxu1 %v3922_v9  ;;  %v4073_v9 = vld [vmem:[#allocation6 + $0x260] ss:$16 sps:$4 sm:$0xff]  }
  0xd6   :  { %1682 = vmatpush2.bf16.msra.mxu0 %v3917_v10  ;;  %v4075_v10 = vld [vmem:[#allocation6 + $0x264] ss:$16 sps:$4 sm:$0xff]  }
  0xd7   :  { %1707 = vmatpush1.bf16.msra.mxu1 %v3920_v11  ;;  %1683 = vmatprep.subr.bf16.mxu0 %v3925_v12  ;;  %v4003_v11 = vld [vmem:[#allocation6 + $0x1e4] ss:$16 sps:$4 sm:$0xff]   ;;  %v4001_v12 = vld [vmem:[#allocation6 + $0x1e0] ss:$16 sps:$4 sm:$0xff]  }
  0xd8   :  { %1708 = vmatprep.subr.bf16.mxu1 %v3928_v13  ;;  %v4079_v13 = vld [vmem:[#allocation6 + $0x240] ss:$16 sps:$4 sm:$0xff]  }
  0xda   :  { %1684 = vmatpush2.bf16.msra.mxu0 %v3923_v14  ;;  %v4081_v14 = vld [vmem:[#allocation6 + $0x244] ss:$16 sps:$4 sm:$0xff]  }
  0xdb   :  { %1709 = vmatpush1.bf16.msra.mxu1 %v3926_v17  ;;  %1735 = vmatprep.subr.bf16.mxu0 %v3934_v19  ;;  %v4006_v17 = vld [vmem:[#allocation6 + $0x1c4] ss:$16 sps:$4 sm:$0xff]  }
  0xdc   :  { %1710 = vmatprep.subr.bf16.mxu1 %v3931_v18 }
  0xdd   :  { %1686 = vmatmul.mubr.bf16.vlgmr.msra.gmra.mxu0 %v4329_v7  ;;  %v3955_v7 = vld [vmem:[#allocation3 + $0x56c] ss:$16 sps:$4 sm:$0xff]  }
  0xde   :  { %1736 = vmatpush1.bf16.msra.mxu0 %v3932_v21  ;;  %1767 = vmatprep.mubr.bf16.mxu0 %v4272_v16  ;;  %v3964_v16 = vld [vmem:[#allocation3 + $0x64c] ss:$16 sps:$4 sm:$0xff]  }
  0xdf   :  { %1711 = vmatpush2.bf16.msra.mxu1 %v3929_v20  ;;  %1737 = vmatprep.subr.bf16.mxu0 %v3940_v23  ;;  %v4004_v20 = vld [vmem:[#allocation6 + $0x1c0] ss:$16 sps:$4 sm:$0xff]   ;;  %v4009_v23 = vld [vmem:[#allocation6 + $0x1a4] ss:$16 sps:$4 sm:$0xff]  }
  0xe0   :  { %1712 = vmatprep.subr.bf16.mxu1 %v3937_v22 }
  0xe2   :  { %1738 = vmatpush1.bf16.msra.mxu0 %v3938_v25  ;;  %v4085_v25 = vld [vmem:[#allocation6 + $0x220] ss:$16 sps:$4 sm:$0xff]  }
  0xe3   :  { %1713 = vmatpush2.bf16.msra.mxu1 %v3935_v24  ;;  %1739 = vmatprep.subr.bf16.mxu0 %v3946_v27  ;;  %v4087_v24 = vld [vmem:[#allocation6 + $0x224] ss:$16 sps:$4 sm:$0xff]  }
  0xe4   :  { %1714 = vmatprep.subr.bf16.mxu1 %v3943_v26 }
  0xe6   :  { %1740 = vmatpush1.bf16.msra.mxu0 %v3944_v29 }
  0xe7   :  { %1715 = vmatpush2.bf16.msra.mxu1 %v3941_v28  ;;  %1741 = vmatprep.subr.bf16.mxu0 %v3952_v31  ;;  %v4007_v28 = vld [vmem:[#allocation6 + $0x1a0] ss:$16 sps:$4 sm:$0xff]   ;;  %v4012_v31 = vld [vmem:[#allocation6 + $0x184] ss:$16 sps:$4 sm:$0xff]  }
  0xe8   :  { %1716 = vmatprep.subr.bf16.mxu1 %v3949_v30 }
  0xea   :  { %1742 = vmatpush1.bf16.msra.mxu0 %v3950_v33  ;;  %v4093_v33 = vld [vmem:[#allocation6 + $0x204] ss:$16 sps:$4 sm:$0xff]  }
  0xeb   :  { %1717 = vmatpush2.bf16.msra.mxu1 %v3947_v32  ;;  %1743 = vmatprep.subr.bf16.mxu0 %v3958_v51  ;;  %v4091_v32 = vld [vmem:[#allocation6 + $0x200] ss:$16 sps:$4 sm:$0xff]  }
  0xec   :  { %1718 = vmatprep.subr.bf16.mxu1 %v3955_v7  ;;  %v4010_v7 = vld [vmem:[#allocation6 + $0x180] ss:$16 sps:$4 sm:$0xff]  }
  0xed   :  { %v4097_v51 = vld [vmem:[#allocation6 + $0x3e0] ss:$16 sps:$4 sm:$0xff]  }
  0xee   :  { %1744 = vmatpush1.bf16.msra.mxu0 %v3956_v36  ;;  %v4015_v36 = vld [vmem:[#allocation6 + $0x164] ss:$16 sps:$4 sm:$0xff]  }
  0xef   :  { %1719 = vmatpush2.bf16.msra.mxu1 %v3953_v34  ;;  %1745 = vmatprep.subr.bf16.mxu0 %v3964_v16  ;;  %v4099_v34 = vld [vmem:[#allocation6 + $0x3e4] ss:$16 sps:$4 sm:$0xff]   ;;  %v4013_v16 = vld [vmem:[#allocation6 + $0x160] ss:$16 sps:$4 sm:$0xff]  }
  0xf0   :  { %1720 = vmatprep.subr.bf16.mxu1 %v3961_v37  ;;  %v4102_v37 = vld [vmem:[#allocation6 + $0x3c4] ss:$16 sps:$4 sm:$0xff]  }
  0xf2   :  { %1746 = vmatpush1.bf16.msra.mxu0 %v3962_v39  ;;  %v4018_v39 = vld [vmem:[#allocation6 + $0x144] ss:$16 sps:$4 sm:$0xff]  }
  0xf3   :  { %1721 = vmatpush2.bf16.msra.mxu1 %v3959_v38  ;;  %1747 = vmatprep.subr.bf16.mxu0 %v3970_v41  ;;  %v4100_v38 = vld [vmem:[#allocation6 + $0x3c0] ss:$16 sps:$4 sm:$0xff]  }
  0xf4   :  { %1722 = vmatprep.subr.bf16.mxu1 %v3967_v40  ;;  %v4105_v40 = vld [vmem:[#allocation6 + $0x3a4] ss:$16 sps:$4 sm:$0xff]   ;;  %v4016_v41 = vld [vmem:[#allocation6 + $0x140] ss:$16 sps:$4 sm:$0xff]  }
  0xf6   :  { %1748 = vmatpush1.bf16.msra.mxu0 %v3968_v43  ;;  %v4021_v43 = vld [vmem:[#allocation6 + $0x124] ss:$16 sps:$4 sm:$0xff]  }
  0xf7   :  { %1723 = vmatpush2.bf16.msra.mxu1 %v3965_v42  ;;  %1749 = vmatprep.subr.bf16.mxu0 %v3976_v45  ;;  %v4103_v42 = vld [vmem:[#allocation6 + $0x3a0] ss:$16 sps:$4 sm:$0xff]  }
  0xf8   :  { %1724 = vmatprep.subr.bf16.mxu1 %v3973_v44  ;;  %v4108_v44 = vld [vmem:[#allocation6 + $0x384] ss:$16 sps:$4 sm:$0xff]   ;;  %v4019_v45 = vld [vmem:[#allocation6 + $0x120] ss:$16 sps:$4 sm:$0xff]  }
  0xfa   :  { %1750 = vmatpush1.bf16.msra.mxu0 %v3974_v48  ;;  %v4024_v48 = vld [vmem:[#allocation6 + $0x104] ss:$16 sps:$4 sm:$0xff]  }
  0xfb   :  { %1725 = vmatpush2.bf16.msra.mxu1 %v3971_v46  ;;  %2605 = vmatprep.subr.bf16.mxu0 %v3979_v49  ;;  %v4106_v46 = vld [vmem:[#allocation6 + $0x380] ss:$16 sps:$4 sm:$0xff]   ;;  %v4111_v49 = vld [vmem:[#allocation6 + $0x364] ss:$16 sps:$4 sm:$0xff]  }
  0xfc   :  { %2646 = vmatprep.subr.bf16.mxu1 %v4051_v60 }
  0xfd   :  { %1768 = vmatmul.mubr.bf16.vlgmr.msra.gmra.mxu0 %v4201_v53  ;;  %v4027_v53 = vld [vmem:[#allocation6 + $0xec] ss:$16 sps:$4 sm:$0xff]  }
  0xfe   :  { %1727 = vmatmul.mubr.bf16.vlgmr.msra.gmra.mxu1 %v4350_v15  ;;  %2606 = vmatpush1.bf16.msra.mxu0 %v3977_v50  ;;  %v3989_v15 = vld [vmem:[#allocation6 + $0x60] ss:$16 sps:$4 sm:$0xff]  }
  0xff   :  { %2607 = vmatprep.subr.bf16.mxu0 %v3982_v52  ;;  %2647 = vmatpush1.bf16.msra.mxu1 %v4049_v59  ;;  %v4022_v50 = vld [vmem:[#allocation6 + $0x100] ss:$16 sps:$4 sm:$0xff]  }
 0x100   :  { %2648 = vmatprep.subr.bf16.mxu1 %v4057_v47  ;;  %v4109_v52 = vld [vmem:[#allocation6 + $0x360] ss:$16 sps:$4 sm:$0xff]   ;;  %v4123_v47 = vld [vmem:[#allocation6 + $0x2ec] ss:$16 sps:$4 sm:$0xff]  }
 0x101   :  { %v4115_v59 = vld [vmem:[#allocation6 + $0x320] ss:$16 sps:$4 sm:$0xff]  }
 0x102   :  { %2608 = vmatpush1.bf16.msra.mxu0 %v3980_v54  ;;  %v4114_v54 = vld [vmem:[#allocation6 + $0x344] ss:$16 sps:$4 sm:$0xff]  }
 0x103   :  { %2609 = vmatprep.subr.bf16.mxu0 %v3985_v55  ;;  %2649 = vmatpush1.bf16.msra.mxu1 %v4055_v62  ;;  %v4112_v55 = vld [vmem:[#allocation6 + $0x340] ss:$16 sps:$4 sm:$0xff]  }
 0x104   :  { %2650 = vmatprep.subr.bf16.mxu1 %v4063_v1  ;;  %v4118_v62 = vld [vmem:[#allocation6 + $0x300] ss:$16 sps:$4 sm:$0xff]  }
 0x105   :  { %v4376_v1 = vld [vmem:[%s4522_s4] ss:$2 sm:$0xf] }
 0x106   :  { %2610 = vmatpush1.bf16.msra.mxu0 %v3983_v56 }
 0x107   :  { %2611 = vmatprep.subr.bf16.mxu0 %v3988_v57  ;;  %2651 = vmatpush1.bf16.msra.mxu1 %v4061_v0 }
 0x108   :  { %2652 = vmatprep.subr.bf16.mxu1 %v4069_v35 }
 0x10a   :  { %2612 = vmatpush1.bf16.msra.mxu0 %v3986_v58  ;;  %v4117_v58 = vld [vmem:[#allocation6 + $0x324] ss:$16 sps:$4 sm:$0xff]  }
 0x10b   :  { %2613 = vmatprep.subr.bf16.mxu0 %v3991_v61  ;;  %2653 = vmatpush1.bf16.msra.mxu1 %v4067_v4 }
 0x10c   :  { %2654 = vmatprep.subr.bf16.mxu1 %v4075_v10 }
 0x10e   :  { %2614 = vmatpush1.bf16.msra.mxu0 %v3989_v15  ;;  %v4120_v15 = vld [vmem:[#allocation6 + $0x304] ss:$16 sps:$4 sm:$0xff]  }
 0x10f   :  { %2615 = vmatprep.subr.bf16.mxu0 %v3994_v6  ;;  %2655 = vmatpush1.bf16.msra.mxu1 %v4073_v9  ;;  %v283_v6 = vlaneseq }
 0x110   :  { %2656 = vmatprep.subr.bf16.mxu1 %v4081_v14 }
 0x112   :  { %2616 = vmatpush1.bf16.msra.mxu0 %v3992_v63  ;;  %v4370_v63 = vshrl.u32 %v283_v6, 7 }
 0x113   :  { %2617 = vmatprep.subr.bf16.mxu0 %v3997_v2  ;;  %2657 = vmatpush1.bf16.msra.mxu1 %v4079_v13 }
 0x114   :  { %2658 = vmatprep.subr.bf16.mxu1 %v4087_v24  ;;  %v285_v0 = vsub.s32 0, %v4370_v63  ;;  %v289_v2 = vsub.s32 1, %v4370_v63 }
 0x116   :  { %2618 = vmatpush1.bf16.msra.mxu0 %v3995_v3  ;;  %v286_v3 = vrot.slane %v4376_v1, %v285_v0  ;;  %v290_v4 = vrot.slane %v4376_v1, %v289_v2 }
 0x117   :  { %2619 = vmatprep.subr.bf16.mxu0 %v4000_v5  ;;  %2659 = vmatpush1.bf16.msra.mxu1 %v4085_v25 }
 0x118   :  { %2660 = vmatprep.subr.bf16.mxu1 %v4093_v33  ;;  %v4042_v33 = vld [vmem:[#allocation6 + $0x4c] ss:$16 sps:$4 sm:$0xff]  }
 0x11a   :  { %2620 = vmatpush1.bf16.msra.mxu0 %v3998_v8 }
 0x11b   :  { %2621 = vmatprep.subr.bf16.mxu0 %v4003_v11  ;;  %2661 = vmatpush1.bf16.msra.mxu1 %v4091_v32  ;;  %v4037_v32 = vld [vmem:[#allocation6 + $0x68] ss:$16 sps:$4 sm:$0xff]  }
 0x11c   :  { %2662 = vmatprep.subr.bf16.mxu1 %v4099_v34 }
 0x11d   :  { %v4362_v18 = vpop.f32.mrf.mxu0 }
 0x11e   :  { %v4364_v19 = vpop.f32.mrf.mxu1  ;;  %2622 = vmatpush2.bf16.msra.mxu0 %v4001_v12  ;;  %v1483_v35 = vadd.f32 %v4362_v18, %v286_v3  ;;  %v4030_v18 = vld [vmem:[#allocation6 + $0xcc] ss:$16 sps:$4 sm:$0xff]  }
 0x11f   :  { %v4366_v21 = vpop.f32.mrf.mxu0  ;;  %2623 = vmatprep.subr.bf16.mxu0 %v4006_v17  ;;  %2663 = vmatpush2.bf16.msra.mxu1 %v4097_v51  ;;  %v4045_v51 = vld [vmem:[#allocation6 + $0x2c] ss:$16 sps:$4 sm:$0xff]  }
 0x120   :  { %v4368_v22 = vpop.f32.mrf.mxu1  ;;  %2664 = vmatprep.subr.bf16.mxu1 %v4102_v37  ;;  %v1485_v5 = vadd.f32 %v4366_v21, %v290_v4  ;;  %v1524_v8 = vadd.f32 %v4364_v19, %v1483_v35  ;;  %v4028_v19 = vld [vmem:[#allocation6 + $0xc8] ss:$16 sps:$4 sm:$0xff]   ;;  %v4033_v21 = vld [vmem:[#allocation6 + $0xac] ss:$16 sps:$4 sm:$0xff]  }
 0x121   :  { %v1486_v26 = vpop.f32.mrf.mxu0 }
 0x122   :  { %v1527_v27 = vpop.f32.mrf.mxu1  ;;  %2624 = vmatpush2.bf16.msra.mxu0 %v4004_v20  ;;  %v1526_v10 = vadd.f32 %v4368_v22, %v1485_v5  ;;  %v4031_v22 = vld [vmem:[#allocation6 + $0xa8] ss:$16 sps:$4 sm:$0xff]  }
 0x123   :  { %v1487_v29 = vpop.f32.mrf.mxu0  ;;  %2625 = vmatprep.subr.bf16.mxu0 %v4009_v23  ;;  %2665 = vmatpush2.bf16.msra.mxu1 %v4100_v38  ;;  %v4025_v27 = vld [vmem:[#allocation6 + $0xe8] ss:$16 sps:$4 sm:$0xff]  }
 0x124   :  { %v1528_v30 = vpop.f32.mrf.mxu1  ;;  %2666 = vmatprep.subr.bf16.mxu1 %v4105_v40  ;;  %v4036_v29 = vld [vmem:[#allocation6 + $0x8c] ss:$16 sps:$4 sm:$0xff]  }
 0x125   :  { %v4034_v30 = vld [vmem:[#allocation6 + $0x88] ss:$16 sps:$4 sm:$0xff]  }
 0x126   :  { %2626 = vmatpush2.bf16.msra.mxu0 %v4007_v28 }
 0x127   :  { %2627 = vmatprep.subr.bf16.mxu0 %v4012_v31  ;;  %2667 = vmatpush2.bf16.msra.mxu1 %v4103_v42  ;;  %v4039_v31 = vld [vmem:[#allocation6 + $0x6c] ss:$16 sps:$4 sm:$0xff]   ;;  %v4052_v42 = vld [vmem:[#allocation6 + $0x1e8] ss:$16 sps:$4 sm:$0xff]  }
 0x128   :  { %2668 = vmatprep.subr.bf16.mxu1 %v4108_v44  ;;  %v4058_v44 = vld [vmem:[#allocation6 + $0x1c8] ss:$16 sps:$4 sm:$0xff]  }
 0x12a   :  { %2628 = vmatpush2.bf16.msra.mxu0 %v4010_v7  ;;  %v4040_v7 = vld [vmem:[#allocation6 + $0x48] ss:$16 sps:$4 sm:$0xff]  }
 0x12b   :  { %2629 = vmatprep.subr.bf16.mxu0 %v4015_v36  ;;  %2669 = vmatpush2.bf16.msra.mxu1 %v4106_v46  ;;  %v4043_v36 = vld [vmem:[#allocation6 + $0x28] ss:$16 sps:$4 sm:$0xff]  }
 0x12c   :  { %2670 = vmatprep.subr.bf16.mxu1 %v4111_v49  ;;  %v4064_v46 = vld [vmem:[#allocation6 + $0x1a8] ss:$16 sps:$4 sm:$0xff]  }
 0x12d   :  { %v4070_v49 = vld [vmem:[#allocation6 + $0x188] ss:$16 sps:$4 sm:$0xff]  }
 0x12e   :  { %2630 = vmatpush2.bf16.msra.mxu0 %v4013_v16  ;;  %v4048_v16 = vld [vmem:[#allocation6 + $0xc] ss:$16 sps:$4 sm:$0xff]  }
 0x12f   :  { %2631 = vmatprep.subr.bf16.mxu0 %v4018_v39  ;;  %2671 = vmatpush2.bf16.msra.mxu1 %v4109_v52  ;;  %v4046_v39 = vld [vmem:[#allocation6 + $0x8] ss:$16 sps:$4 sm:$0xff]  }
 0x130   :  { %2672 = vmatprep.subr.bf16.mxu1 %v4114_v54  ;;  %v4076_v52 = vld [vmem:[#allocation6 + $0x168] ss:$16 sps:$4 sm:$0xff]  }
 0x131   :  { %v4082_v54 = vld [vmem:[#allocation6 + $0x148] ss:$16 sps:$4 sm:$0xff]  }
 0x132   :  { %2632 = vmatpush2.bf16.msra.mxu0 %v4016_v41  ;;  %v4054_v41 = vld [vmem:[#allocation6 + $0x1ec] ss:$16 sps:$4 sm:$0xff]  }
 0x133   :  { %2633 = vmatprep.subr.bf16.mxu0 %v4021_v43  ;;  %2673 = vmatpush2.bf16.msra.mxu1 %v4112_v55  ;;  %v4060_v43 = vld [vmem:[#allocation6 + $0x1cc] ss:$16 sps:$4 sm:$0xff]  }
 0x134   :  { %2674 = vmatprep.subr.bf16.mxu1 %v4117_v58  ;;  %v4090_v55 = vld [vmem:[#allocation6 + $0x12c] ss:$16 sps:$4 sm:$0xff]  }
 0x136   :  { %2634 = vmatpush2.bf16.msra.mxu0 %v4019_v45  ;;  %v4066_v45 = vld [vmem:[#allocation6 + $0x1ac] ss:$16 sps:$4 sm:$0xff]  }
 0x137   :  { %2635 = vmatprep.subr.bf16.mxu0 %v4024_v48  ;;  %2675 = vmatpush2.bf16.msra.mxu1 %v4115_v59  ;;  %v4072_v48 = vld [vmem:[#allocation6 + $0x18c] ss:$16 sps:$4 sm:$0xff]  }
 0x138   :  { %2676 = vmatprep.subr.bf16.mxu1 %v4120_v15  ;;  %v4096_v59 = vld [vmem:[#allocation6 + $0x10c] ss:$16 sps:$4 sm:$0xff]  }
 0x13a   :  { %2636 = vmatpush2.bf16.msra.mxu0 %v4022_v50  ;;  %v4078_v50 = vld [vmem:[#allocation6 + $0x16c] ss:$16 sps:$4 sm:$0xff]  }
 0x13b   :  { %2687 = vmatprep.subr.bf16.mxu0 %v4027_v53  ;;  %2677 = vmatpush2.bf16.msra.mxu1 %v4118_v62  ;;  %v4084_v53 = vld [vmem:[#allocation6 + $0x14c] ss:$16 sps:$4 sm:$0xff]   ;;  %v293_v62 = vsub.s32 2, %v4370_v63 }
 0x13c   :  { %2728 = vmatprep.subr.bf16.mxu1 %v4123_v47  ;;  %v297_v47 = vsub.s32 3, %v4370_v63 }
 0x13d   :  { %v294_v6 = vrot.slane %v4376_v1, %v293_v62 }
 0x13e   :  { %v1605_v56 = vpop.f32.mrf.mxu1  ;;  %v298_v3 = vrot.slane %v4376_v1, %v297_v47  ;;  %v4121_v1 = vld [vmem:[#allocation6 + $0x2e8] ss:$16 sps:$4 sm:$0xff]  }
 0x140   :  { %v1607_v57 = vpop.f32.mrf.mxu1 }
 0x142   :  { %v1609_v60 = vpop.f32.mrf.mxu1 }
 0x144   :  { %v1610_v61 = vpop.f32.mrf.mxu1 }
 0x145   :  { %v4094_v61 = vld [vmem:[#allocation6 + $0x108] ss:$16 sps:$4 sm:$0xff]  }
 0x15d   :  { %v1564_v9 = vpop.f32.mrf.mxu0 }
 0x15e   :  { %v1565_v11 = vadd.f32 %v1564_v9, %v1524_v8 }
 0x15f   :  { %v1566_v12 = vpop.f32.mrf.mxu0 }
 0x160   :  { %v1606_v13 = vadd.f32 %v1605_v56, %v1565_v11  ;;  %v1567_v14 = vadd.f32 %v1566_v12, %v1526_v10 }
 0x161   :  { %v1568_v17 = vpop.f32.mrf.mxu0 }
 0x162   :  { %v1608_v20 = vadd.f32 %v1607_v57, %v1567_v14  ;;  %v1776_v23 = vmax.f32 %v1606_v13, 0.0  ;;  %v4088_v57 = vld [vmem:[#allocation6 + $0x128] ss:$16 sps:$4 sm:$0xff]  }
 0x163   :  { %v1569_v24 = vpop.f32.mrf.mxu0 }
 0x164   :  { %v1777_v25 = vmax.f32 %v1608_v20, 0.0  ;;  %v4389_v28 = vpack.c.bf16 %v1776_v23, %v1776_v23 }
 0x166   :  { %v3577_v26 = vpack.c.bf16 %v1777_v25, %v1777_v25 }
 0x168   :  { %2637 = vmatprep.mubr.bf16.mxu0 %v3577_v26 }
 0x169   :  { %2638 = vmatmul.mubr.bf16.vlgmr.msra.gmra.mxu0 %v4389_v28 }
 0x16a   :  { %2688 = vmatpush1.bf16.msra.mxu0 %v4025_v27  ;;  %2719 = vmatprep.mubr.bf16.mxu0 %v3577_v26 }
 0x16b   :  { %2689 = vmatprep.subr.bf16.mxu0 %v4030_v18 }
 0x16e   :  { %2690 = vmatpush1.bf16.msra.mxu0 %v4028_v19 }
 0x16f   :  { %2691 = vmatprep.subr.bf16.mxu0 %v4033_v21  ;;  %v4126_v21 = vld [vmem:[#allocation6 + $0x2cc] ss:$16 sps:$4 sm:$0xff]  }
 0x172   :  { %2692 = vmatpush1.bf16.msra.mxu0 %v4031_v22  ;;  %v4124_v22 = vld [vmem:[#allocation6 + $0x2c8] ss:$16 sps:$4 sm:$0xff]  }
 0x173   :  { %2693 = vmatprep.subr.bf16.mxu0 %v4036_v29  ;;  %v4129_v29 = vld [vmem:[#allocation6 + $0x2ac] ss:$16 sps:$4 sm:$0xff]  }
 0x176   :  { %2694 = vmatpush1.bf16.msra.mxu0 %v4034_v30  ;;  %v4127_v30 = vld [vmem:[#allocation6 + $0x2a8] ss:$16 sps:$4 sm:$0xff]  }
 0x177   :  { %2695 = vmatprep.subr.bf16.mxu0 %v4039_v31  ;;  %v4132_v31 = vld [vmem:[#allocation6 + $0x28c] ss:$16 sps:$4 sm:$0xff]  }
 0x17a   :  { %2696 = vmatpush1.bf16.msra.mxu0 %v4037_v32  ;;  %v4130_v32 = vld [vmem:[#allocation6 + $0x288] ss:$16 sps:$4 sm:$0xff]  }
 0x17b   :  { %2697 = vmatprep.subr.bf16.mxu0 %v4042_v33  ;;  %v4135_v33 = vld [vmem:[#allocation6 + $0x26c] ss:$16 sps:$4 sm:$0xff]  }
 0x17e   :  { %v1646_v34 = vpop.f32.mrf.mxu1  ;;  %2698 = vmatpush1.bf16.msra.mxu0 %v4040_v7  ;;  %v4133_v7 = vld [vmem:[#allocation6 + $0x268] ss:$16 sps:$4 sm:$0xff]  }
 0x17f   :  { %2699 = vmatprep.subr.bf16.mxu0 %v4045_v51  ;;  %v1647_v4 = vadd.f32 %v1646_v34, %v294_v6  ;;  %v4138_v51 = vld [vmem:[#allocation6 + $0x24c] ss:$16 sps:$4 sm:$0xff]   ;;  %v4136_v34 = vld [vmem:[#allocation6 + $0x248] ss:$16 sps:$4 sm:$0xff]  }
 0x180   :  { %v1648_v37 = vpop.f32.mrf.mxu1  ;;  %v4163_v6 = vld [vmem:[#allocation6 + $0x328] ss:$16 sps:$4 sm:$0xff]  }
 0x181   :  { %v1649_v35 = vadd.f32 %v1648_v37, %v298_v3  ;;  %v4139_v37 = vld [vmem:[#allocation6 + $0x228] ss:$16 sps:$4 sm:$0xff]  }
 0x182   :  { %v1650_v38 = vpop.f32.mrf.mxu1  ;;  %2700 = vmatpush1.bf16.msra.mxu0 %v4043_v36  ;;  %v4141_v36 = vld [vmem:[#allocation6 + $0x22c] ss:$16 sps:$4 sm:$0xff]  }
 0x183   :  { %2701 = vmatprep.subr.bf16.mxu0 %v4048_v16  ;;  %v4144_v16 = vld [vmem:[#allocation6 + $0x20c] ss:$16 sps:$4 sm:$0xff]   ;;  %v4142_v38 = vld [vmem:[#allocation6 + $0x208] ss:$16 sps:$4 sm:$0xff]  }
 0x184   :  { %v1651_v40 = vpop.f32.mrf.mxu1  ;;  %v4178_v3 = vld [vmem:[%s4521_s3 + $0x18] sm:$0xff]  }
 0x185   :  { %v4145_v40 = vld [vmem:[#allocation6 + $0x3e8] ss:$16 sps:$4 sm:$0xff]  }
 0x186   :  { %2702 = vmatpush1.bf16.msra.mxu0 %v4046_v39  ;;  %v4147_v39 = vld [vmem:[#allocation6 + $0x3ec] ss:$16 sps:$4 sm:$0xff]  }
 0x187   :  { %2703 = vmatprep.subr.bf16.mxu0 %v4054_v41  ;;  %v4150_v41 = vld [vmem:[#allocation6 + $0x3cc] ss:$16 sps:$4 sm:$0xff]  }
 0x18a   :  { %2704 = vmatpush2.bf16.msra.mxu0 %v4052_v42  ;;  %v4148_v42 = vld [vmem:[#allocation6 + $0x3c8] ss:$16 sps:$4 sm:$0xff]  }
 0x18b   :  { %2705 = vmatprep.subr.bf16.mxu0 %v4060_v43  ;;  %v4153_v43 = vld [vmem:[#allocation6 + $0x3ac] ss:$16 sps:$4 sm:$0xff]  }
 0x18e   :  { %2706 = vmatpush2.bf16.msra.mxu0 %v4058_v44  ;;  %v4151_v44 = vld [vmem:[#allocation6 + $0x3a8] ss:$16 sps:$4 sm:$0xff]  }
 0x18f   :  { %2707 = vmatprep.subr.bf16.mxu0 %v4066_v45  ;;  %v4156_v45 = vld [vmem:[#allocation6 + $0x38c] ss:$16 sps:$4 sm:$0xff]  }
 0x192   :  { %2708 = vmatpush2.bf16.msra.mxu0 %v4064_v46  ;;  %v4169_v46 = vld [vmem:[%s4521_s3 + $0x78] sm:$0xff]  }
 0x193   :  { %2709 = vmatprep.subr.bf16.mxu0 %v4072_v48  ;;  %v4170_v48 = vld [vmem:[%s4521_s3 + $0x38] sm:$0xff]  }
 0x196   :  { %2710 = vmatpush2.bf16.msra.mxu0 %v4070_v49  ;;  %v4171_v49 = vld [vmem:[%s4521_s3 + $0x70] sm:$0xff]  }
 0x197   :  { %2711 = vmatprep.subr.bf16.mxu0 %v4078_v50  ;;  %v4154_v50 = vld [vmem:[#allocation6 + $0x388] ss:$16 sps:$4 sm:$0xff]  }
 0x19a   :  { %2712 = vmatpush2.bf16.msra.mxu0 %v4076_v52  ;;  %v4172_v52 = vld [vmem:[%s4521_s3 + $0x30] sm:$0xff]  }
 0x19b   :  { %2713 = vmatprep.subr.bf16.mxu0 %v4084_v53  ;;  %v4159_v53 = vld [vmem:[#allocation6 + $0x36c] ss:$16 sps:$4 sm:$0xff]  }
 0x19d   :  { %v1687_v56 = vpop.f32.mrf.mxu0 }
 0x19e   :  { %2714 = vmatpush2.bf16.msra.mxu0 %v4082_v54  ;;  %v1688_v5 = vadd.f32 %v1687_v56, %v1647_v4  ;;  %v4173_v54 = vld [vmem:[%s4521_s3 + $0x68] sm:$0xff]  }
 0x19f   :  { %v1689_v58 = vpop.f32.mrf.mxu0  ;;  %2715 = vmatprep.subr.bf16.mxu0 %v4090_v55  ;;  %v4157_v55 = vld [vmem:[#allocation6 + $0x368] ss:$16 sps:$4 sm:$0xff]   ;;  %v4168_v4 = vld [vmem:[#allocation6 + $0x30c] ss:$16 sps:$4 sm:$0xff]  }
 0x1a0   :  { %v1690_v10 = vadd.f32 %v1689_v58, %v1649_v35  ;;  %v4174_v56 = vld [vmem:[%s4521_s3 + $0x28] sm:$0xff]   ;;  %v4175_v58 = vld [vmem:[%s4521_s3 + $0x60] sm:$0xff]   ;;  %v4179_v35 = vld [vmem:[%s4521_s3 + $0x50] sm:$0xff]  }
 0x1a1   :  { %v1691_v60 = vpop.f32.mrf.mxu0 }
 0x1a2   :  { %2716 = vmatpush2.bf16.msra.mxu0 %v4088_v57  ;;  %v4162_v57 = vld [vmem:[#allocation6 + $0x34c] ss:$16 sps:$4 sm:$0xff]   ;;  %v4176_v60 = vld [vmem:[%s4521_s3 + $0x20] sm:$0xff]  }
 0x1a3   :  { %v1692_v15 = vpop.f32.mrf.mxu0  ;;  %2717 = vmatprep.subr.bf16.mxu0 %v4096_v59  ;;  %v4160_v59 = vld [vmem:[#allocation6 + $0x348] ss:$16 sps:$4 sm:$0xff]  }
 0x1a4   :  { %v4177_v15 = vld [vmem:[%s4521_s3 + $0x58] sm:$0xff]  }
 0x1a6   :  { %2718 = vmatpush2.bf16.msra.mxu0 %v4094_v61  ;;  %v4165_v61 = vld [vmem:[#allocation6 + $0x32c] ss:$16 sps:$4 sm:$0xff]  }
 0x1a7   :  { %3584 = vmatprep.subr.bf16.mxu0 %v4169_v46 }
 0x1a9   :  { %2720 = vmatmul.mubr.bf16.vlgmr.msra.gmra.mxu0 %v4389_v28 }
 0x1aa   :  { %3585 = vmatpush3.bf16.msra.mxu0 %v4170_v48 }
 0x1ab   :  { %3586 = vmatprep.subr.bf16.mxu0 %v4171_v49 }
 0x1ae   :  { %3587 = vmatpush3.bf16.msra.mxu0 %v4172_v52 }
 0x1af   :  { %3588 = vmatprep.subr.bf16.mxu0 %v4173_v54 }
 0x1b2   :  { %3589 = vmatpush3.bf16.msra.mxu0 %v4174_v56 }
 0x1b3   :  { %3590 = vmatprep.subr.bf16.mxu0 %v4175_v58 }
 0x1b6   :  { %3591 = vmatpush3.bf16.msra.mxu0 %v4176_v60 }
 0x1b7   :  { %3592 = vmatprep.subr.bf16.mxu0 %v4177_v15 }
 0x1ba   :  { %3593 = vmatpush3.bf16.msra.mxu0 %v4178_v3 }
 0x1bb   :  { %3594 = vmatprep.subr.bf16.mxu0 %v4179_v35 }
 0x1bd   :  { %v1769_v9 = vpop.f32.mrf.mxu0 }
 0x1be   :  { %v1728_v8 = vpop.f32.mrf.mxu1 }
 0x1bf   :  { %v1729_v11 = vadd.f32 %v1728_v8, %v1688_v5  ;;  %v1771_v13 = vpop.f32.mrf.mxu0  ;;  %v4166_v5 = vld [vmem:[#allocation6 + $0x308] ss:$16 sps:$4 sm:$0xff]   ;;  %v4180_v8 = vld [vmem:[%s4521_s3 + $0x10] sm:$0xff]  }
 0x1c0   :  { %v1730_v12 = vpop.f32.mrf.mxu1  ;;  %3595 = vmatpush3.bf16.msra.mxu0 %v4180_v8 }
 0x1c1   :  { %v1770_v14 = vadd.f32 %v1769_v9, %v1729_v11  ;;  %v1731_v17 = vadd.f32 %v1730_v12, %v1690_v10  ;;  %v1773_v23 = vpop.f32.mrf.mxu0  ;;  %v4181_v9 = vld [vmem:[%s4521_s3 + $0x48] sm:$0xff]   ;;  %v4183_v11 = vld [vmem:[%s4521_s3 + $0x40] sm:$0xff]  }
 0x1c2   :  { %v1732_v20 = vpop.f32.mrf.mxu1  ;;  %v4182_v10 = vld [vmem:[%s4521_s3 + $0x8] sm:$0xff]   ;;  %3596 = vmatprep.subr.bf16.mxu0 %v4181_v9  ;;  %v4184_v12 = vld [vmem:[%s4521_s3] sm:$0xff]  }
 0x1c3   :  { %v1772_v24 = vadd.f32 %v1771_v13, %v1731_v17  ;;  %v1778_v25 = vmax.f32 %v1770_v14, 0.0  ;;  %v1774_v27 = vpop.f32.mrf.mxu0  ;;  %v4185_v13 = vld [vmem:[%s4521_s3 + $0xf8] sm:$0xff]   ;;  %v4187_v17 = vld [vmem:[%s4521_s3 + $0xf0] sm:$0xff]   ;;  %v4189_v23 = vld [vmem:[%s4521_s3 + $0xe8] sm:$0xff]  }
 0x1c4   :  { %v1733_v26 = vpop.f32.mrf.mxu1  ;;  %3597 = vmatpush3.bf16.msra.mxu0 %v4182_v10  ;;  %v4186_v14 = vld [vmem:[%s4521_s3 + $0xb8] sm:$0xff]   ;;  %v4188_v20 = vld [vmem:[%s4521_s3 + $0xb0] sm:$0xff]  }
 0x1c5   :  { %v1779_v28 = vmax.f32 %v1772_v24, 0.0  ;;  %v4401_v19 = vpack.c.bf16 %v1778_v25, %v1778_v25  ;;  %3598 = vmatprep.subr.bf16.mxu0 %v4183_v11  ;;  %v4190_v24 = vld [vmem:[%s4521_s3 + $0xa8] sm:$0xff]   ;;  %v4191_v25 = vld [vmem:[%s4521_s3 + $0xe0] sm:$0xff]   ;;  %v4193_v27 = vld [vmem:[%s4521_s3 + $0xd8] sm:$0xff]  }
 0x1c6   :  { %v4192_v26 = vld [vmem:[%s4521_s3 + $0xa0] sm:$0xff]  }
 0x1c7   :  { %v3579_v18 = vpack.c.bf16 %v1779_v28, %v1779_v28  ;;  %v4194_v28 = vld [vmem:[%s4521_s3 + $0x98] sm:$0xff]  }
 0x1c8   :  { %3599 = vmatpush3.bf16.msra.mxu0 %v4184_v12 }
 0x1c9   :  { %2678 = vmatprep.mubr.bf16.mxu1 %v3579_v18 }
 0x1ca   :  { %2679 = vmatmul.mubr.bf16.vlgmr.msra.gmra.mxu1 %v4401_v19 }
 0x1cb   :  { %2729 = vmatpush1.bf16.msra.mxu1 %v4121_v1  ;;  %2760 = vmatprep.mubr.bf16.mxu1 %v3579_v18  ;;  %v4195_v18 = vld [vmem:[%s4521_s3 + $0xd0] sm:$0xff]  }
 0x1cc   :  { %2730 = vmatprep.subr.bf16.mxu1 %v4126_v21  ;;  %v4196_v1 = vld [vmem:[%s4521_s3 + $0x90] sm:$0xff]  }
 0x1cf   :  { %2731 = vmatpush1.bf16.msra.mxu1 %v4124_v22 }
 0x1d0   :  { %2732 = vmatprep.subr.bf16.mxu1 %v4129_v29 }
 0x1d3   :  { %2733 = vmatpush1.bf16.msra.mxu1 %v4127_v30  ;;  %v4197_v30 = vld [vmem:[%s4521_s3 + $0xc8] sm:$0xff]  }
 0x1d4   :  { %2734 = vmatprep.subr.bf16.mxu1 %v4132_v31  ;;  %v4198_v31 = vld [vmem:[%s4521_s3 + $0x88] sm:$0xff]  }
 0x1d7   :  { %2735 = vmatpush1.bf16.msra.mxu1 %v4130_v32  ;;  %v4199_v32 = vld [vmem:[%s4521_s3 + $0xc0] sm:$0xff]  }
 0x1d8   :  { %2736 = vmatprep.subr.bf16.mxu1 %v4135_v33  ;;  %v4200_v33 = vld [vmem:[%s4521_s3 + $0x80] sm:$0xff]  }
 0x1db   :  { %2737 = vmatpush1.bf16.msra.mxu1 %v4133_v7 }
 0x1dc   :  { %2738 = vmatprep.subr.bf16.mxu1 %v4138_v51 }
 0x1df   :  { %2739 = vmatpush1.bf16.msra.mxu1 %v4136_v34 }
 0x1e0   :  { %2740 = vmatprep.subr.bf16.mxu1 %v4141_v36 }
 0x1e3   :  { %2741 = vmatpush1.bf16.msra.mxu1 %v4139_v37  ;;  %v3400_v37 = vld [vmem:[%s4522_s4 + $0x1] ss:$2 sm:$0xf] }
 0x1e4   :  { %2742 = vmatprep.subr.bf16.mxu1 %v4144_v16  ;;  %v1934_v16 = vrot.slane %v3400_v37, %v285_v0  ;;  %v1942_v0 = vrot.slane %v3400_v37, %v293_v62 }
 0x1e7   :  { %2743 = vmatpush1.bf16.msra.mxu1 %v4142_v38  ;;  %v1938_v38 = vrot.slane %v3400_v37, %v289_v2  ;;  %v1946_v2 = vrot.slane %v3400_v37, %v297_v47  ;;  %v3535_v47 = vld [vmem:[%s4523_s5] ss:$0 sm:$0xff] }
 0x1e8   :  { %2744 = vmatprep.subr.bf16.mxu1 %v4147_v39 }
 0x1eb   :  { %2745 = vmatpush2.bf16.msra.mxu1 %v4145_v40 }
 0x1ec   :  { %2746 = vmatprep.subr.bf16.mxu1 %v4150_v41 }
 0x1ef   :  { %2747 = vmatpush2.bf16.msra.mxu1 %v4148_v42 }
 0x1f0   :  { %2748 = vmatprep.subr.bf16.mxu1 %v4153_v43 }
 0x1f3   :  { %2749 = vmatpush2.bf16.msra.mxu1 %v4151_v44 }
 0x1f4   :  { %2750 = vmatprep.subr.bf16.mxu1 %v4156_v45 }
 0x1f7   :  { %2751 = vmatpush2.bf16.msra.mxu1 %v4154_v50 }
 0x1f8   :  { %2752 = vmatprep.subr.bf16.mxu1 %v4159_v53 }
 0x1fb   :  { %2753 = vmatpush2.bf16.msra.mxu1 %v4157_v55 }
 0x1fc   :  { %2754 = vmatprep.subr.bf16.mxu1 %v4162_v57 }
 0x1ff   :  { %2755 = vmatpush2.bf16.msra.mxu1 %v4160_v59 }
 0x200   :  { %2756 = vmatprep.subr.bf16.mxu1 %v4165_v61 }
 0x203   :  { %2757 = vmatpush2.bf16.msra.mxu1 %v4163_v6 }
 0x204   :  { %2758 = vmatprep.subr.bf16.mxu1 %v4168_v4 }
 0x207   :  { %2759 = vmatpush2.bf16.msra.mxu1 %v4166_v5 }
 0x208   :  { %3606 = vmatprep.subr.bf16.mxu1 %v4185_v13 }
 0x20a   :  { %2761 = vmatmul.mubr.bf16.vlgmr.msra.gmra.mxu1 %v4401_v19 }
 0x20b   :  { %3607 = vmatpush3.bf16.msra.mxu1 %v4186_v14 }
 0x20c   :  { %3608 = vmatprep.subr.bf16.mxu1 %v4187_v17 }
 0x20f   :  { %3609 = vmatpush3.bf16.msra.mxu1 %v4188_v20 }
 0x210   :  { %3610 = vmatprep.subr.bf16.mxu1 %v4189_v23 }
 0x213   :  { %3611 = vmatpush3.bf16.msra.mxu1 %v4190_v24 }
 0x214   :  { %3612 = vmatprep.subr.bf16.mxu1 %v4191_v25 }
 0x217   :  { %3613 = vmatpush3.bf16.msra.mxu1 %v4192_v26 }
 0x218   :  { %3614 = vmatprep.subr.bf16.mxu1 %v4193_v27 }
 0x21b   :  { %3615 = vmatpush3.bf16.msra.mxu1 %v4194_v28 }
 0x21c   :  { %3616 = vmatprep.subr.bf16.mxu1 %v4195_v18 }
 0x21f   :  { %3617 = vmatpush3.bf16.msra.mxu1 %v4196_v1 }
 0x220   :  { %3618 = vmatprep.subr.bf16.mxu1 %v4197_v30 }
 0x223   :  { %3619 = vmatpush3.bf16.msra.mxu1 %v4198_v31 }
 0x224   :  { %3620 = vmatprep.subr.bf16.mxu1 %v4199_v32 }
 0x227   :  { %3621 = vmatpush3.bf16.msra.mxu1 %v4200_v33 }
 0x229   :  { %v2639_v19 = vpop.f32.mrf.mxu0 }
 0x22a   :  { %v2640_v39 = vadd.f32 %v2639_v19, %v1934_v16 }
 0x22b   :  { %v2641_v21 = vpop.f32.mrf.mxu0 }
 0x22c   :  { %v2642_v41 = vadd.f32 %v2641_v21, %v1938_v38 }
 0x22d   :  { %v2643_v22 = vpop.f32.mrf.mxu0 }
 0x22f   :  { %v2644_v29 = vpop.f32.mrf.mxu0 }
 0x269   :  { %v2721_v7 = vpop.f32.mrf.mxu0 }
 0x26a   :  { %v2722_v53 = vadd.f32 %v2721_v7, %v1942_v0 }
 0x26b   :  { %v2723_v51 = vpop.f32.mrf.mxu0 }
 0x26c   :  { %v2724_v55 = vadd.f32 %v2723_v51, %v1946_v2 }
 0x26d   :  { %v2725_v34 = vpop.f32.mrf.mxu0 }
 0x26f   :  { %v2726_v36 = vpop.f32.mrf.mxu0 }
 0x28a   :  { %v2680_v40 = vpop.f32.mrf.mxu1 }
 0x28b   :  { %v2681_v42 = vadd.f32 %v2680_v40, %v2640_v39 }
 0x28c   :  { %v2682_v43 = vpop.f32.mrf.mxu1 }
 0x28d   :  { %v2683_v44 = vadd.f32 %v2682_v43, %v2642_v41  ;;  %v2769_v45 = vmax.f32 %v2681_v42, 0.0 }
 0x28e   :  { %v2684_v46 = vpop.f32.mrf.mxu1 }
 0x28f   :  { %v2770_v48 = vmax.f32 %v2683_v44, 0.0  ;;  %v3580_v52 = vpack.c.bf16 %v2769_v45, %v2769_v45 }
 0x290   :  { %v2685_v49 = vpop.f32.mrf.mxu1 }
 0x291   :  { %v3581_v50 = vpack.c.bf16 %v2770_v48, %v2770_v48 }
 0x293   :  { %3102 = vmatprep.mubr.bf16.mxu0 %v3581_v50 }
 0x294   :  { %3103 = vmatmul.mubr.bf16.vlgmr.msra.gmra.mxu0 %v3580_v52 }
 0x2ca   :  { %v2762_v54 = vpop.f32.mrf.mxu1 }
 0x2cb   :  { %v2763_v56 = vadd.f32 %v2762_v54, %v2722_v53 }
 0x2cc   :  { %v2764_v57 = vpop.f32.mrf.mxu1 }
 0x2cd   :  { %v2765_v58 = vadd.f32 %v2764_v57, %v2724_v55  ;;  %v2771_v59 = vmax.f32 %v2763_v56, 0.0 }
 0x2ce   :  { %v2766_v60 = vpop.f32.mrf.mxu1 }
 0x2cf   :  { %v2772_v61 = vmax.f32 %v2765_v58, 0.0  ;;  %v3582_v3 = vpack.c.bf16 %v2771_v59, %v2771_v59 }
 0x2d0   :  { %v2767_v15 = vpop.f32.mrf.mxu1 }
 0x2d1   :  { %v3583_v6 = vpack.c.bf16 %v2772_v61, %v2772_v61 }
 0x2d3   :  { %3142 = vmatprep.mubr.bf16.mxu1 %v3583_v6 }
 0x2d4   :  { %3143 = vmatmul.mubr.bf16.vlgmr.msra.gmra.mxu1 %v3582_v3 }
 0x354   :  { %v3600_v4 = vpop.f32.mrf.mxu0 }
 0x356   :  { %v3601_v35 = vpop.f32.mrf.mxu0 }
 0x357   :  { %v3602_v63 = vadd.f32 %v3601_v35, %v3600_v4 }
 0x358   :  { %v3603_v62 = vpop.f32.mrf.mxu0 }
 0x359   :  { %v3105_v10 = vadd.f32 %v3602_v63, %v3535_v47 }
 0x35a   :  { %v3604_v5 = vpop.f32.mrf.mxu0 }
 0x394   :  { %v3622_v8 = vpop.f32.mrf.mxu1 }
 0x396   :  { %v3623_v9 = vpop.f32.mrf.mxu1 }
 0x397   :  { %v3624_v11 = vadd.f32 %v3623_v9, %v3622_v8 }
 0x398   :  { %v3625_v12 = vpop.f32.mrf.mxu1 }
 0x399   :  { %v3145_v13 = vadd.f32 %v3624_v11, %v3105_v10 }
 0x39a   :  { %v3626_v14 = vpop.f32.mrf.mxu1 }
 0x39b   :  { %3150 = vst [vmem:[#allocation8] sm:$0xff] %v3145_v13 }
 0x39c   :  { %4253 = shalt.err (!%p4250_p0)
}
 0x39d   :  { %3160 = dma.vmem_to_hbm [thread:$0]  %s3158_s7, 128, %s4524_s6, [#allocation5]  }
 0x39e   :  { %4266 = dma.done.wait [#allocation5], 128  }
 0x39f   :  { %4267 = vsyncadd [#allocation5], 4294967168 }
 0x3a0   :  { %3164 = vsyncpa [#allocation4], 1 }
 0x3a1   :  { %3165 = vsyncpa [#allocation7], 1 }
 0x3a2   :  { %3166 = vsyncpa [#allocation5], 1 }

</bundles_post_ra>
